<compile_context>
chip_gen: v5e
topology: v5e:2x2
jax: 0.10.0
libtpu: 0.0.40
codegen_flags: <defaults>
</compile_context>

<pallas_src>
import jax
import jax.numpy as jnp
import numpy as np
from jax import lax
from jax.experimental import pallas as pl
from jax.experimental.pallas import tpu as pltpu

H = 50          # torch hidden size
INPUT = 1
HP = 128        # hidden padded to one full vreg lane width
GS = 128        # per-gate lane stride (vreg-aligned gate slabs)
GP = 4 * GS     # fused gate width (512)


def _sigmoid(x):
    # sigmoid(x) == 0.5 * tanh(0.5 * x) + 0.5  (single EUP op; matches XLA logistic)
    return 0.5 * jnp.tanh(0.5 * x) + 0.5


def _make_lstm_kernel(TC, B_pad):
    def kernel(x_ref, wrow_ref, brow_ref, whh_ref, wlin_ref, blin_ref,
               y_ref, h_scr, c_scr, hh_scr):
        # x_ref:    (TC, B_pad, 1)   raw inputs for this time chunk
        # wrow_ref: (1, GP)          W_ih (K=1) packed into 128-lane gate slabs
        # brow_ref: (1, GP)          b_ih + b_hh packed the same way
        # whh_ref:  (HP, GP)         W_hh^T packed/padded, gate-major 128-lane slabs
        # wlin_ref: (1, HP)          Linear(50,1) weight row, zero-padded
        # blin_ref: (1, 1)           Linear bias
        # y_ref:    (1, TC, B_pad)   per-chunk output block
        # h_scr/c_scr: (B_pad, HP)   recurrent state, persists across grid steps
        # hh_scr:   (TC, B_pad, HP)  h history for this chunk (Linear applied once)

        @pl.when(pl.program_id(0) == 0)
        def _():
            h_scr[...] = jnp.zeros_like(h_scr)
            c_scr[...] = jnp.zeros_like(c_scr)

        whh = whh_ref[...]          # hoisted: loaded once per chunk
        wrow = wrow_ref[...]
        brow = brow_ref[...]

        def step(t, carry):
            h, c = carry
            x_t = x_ref[t]                                   # (B_pad, 1)
            # in-kernel rank-1 input projection (VPU broadcast FMA, off the serial
            # chain) + the recurrent MXU matmul.
            gates = x_t * wrow + brow + jnp.dot(
                h, whh, preferred_element_type=jnp.float32)  # (B_pad, GP)
            # PyTorch gate order i, f, g, o; each slab is 128-lane aligned and
            # zero-padded, so padded lanes of c/h remain exactly 0.
            i_g = _sigmoid(gates[:, 0 * GS:1 * GS])
            f_g = _sigmoid(gates[:, 1 * GS:2 * GS])
            g_g = jnp.tanh(gates[:, 2 * GS:3 * GS])
            o_g = _sigmoid(gates[:, 3 * GS:4 * GS])
            c = f_g * c + i_g * g_g
            h = o_g * jnp.tanh(c)
            hh_scr[t] = h
            return (h, c)

        h_fin, c_fin = lax.fori_loop(0, TC, step, (h_scr[...], c_scr[...]),
                                     unroll=8)
        h_scr[...] = h_fin
        c_scr[...] = c_fin

        # Batched Linear(50 -> 1): one VPU multiply + one lane reduce + one dense
        # (TC, B_pad) store per chunk (replaces T masked 1-lane stores).
        wlin = wlin_ref[...].reshape(1, 1, HP)
        y_chunk = jnp.sum(hh_scr[...] * wlin, axis=-1) + blin_ref[...]  # (TC, B_pad)
        y_ref[0] = y_chunk

    return kernel


def lstm_forward(x, w_ih, w_hh, b_ih, b_hh, w_lin, b_lin):
    """x: (B, T, 1) float32, batch_first (PyTorch convention). Returns (B, T, 1)."""
    B, T, _ = x.shape
    B_pad = ((B + 7) // 8) * 8
    TC = min(128, ((T + 7) // 8) * 8)       # time-chunk length (multiple of 8)
    num_chunks = pl.cdiv(T, TC)
    T_pad = num_chunks * TC

    # ---- inputs laid out (T_pad, B_pad, 1); streamed one chunk per grid step ----
    x_tb = jnp.transpose(x[..., 0], (1, 0))                               # (T, B)
    x_tb = jnp.pad(x_tb, ((0, T_pad - T), (0, B_pad - B)))[..., None]     # (T_pad,B_pad,1)

    # ---- pack parameters into 128-lane-aligned gate slabs (order i, f, g, o) ----
    w_row = jnp.pad(w_ih[:, 0].reshape(4, H),
                    ((0, 0), (0, GS - H))).reshape(1, GP)                 # (1, 512)
    b_row = jnp.pad((b_ih + b_hh).reshape(4, H),
                    ((0, 0), (0, GS - H))).reshape(1, GP)                 # (1, 512)

    whh = w_hh.reshape(4, H, H)                                  # (gate, out, in)
    whh = jnp.pad(whh, ((0, 0), (0, GS - H), (0, HP - H)))       # (4, 128, 128)
    whh_packed = jnp.transpose(whh, (2, 0, 1)).reshape(HP, GP)   # (128, 512)

    wlin_p = jnp.pad(w_lin, ((0, 0), (0, HP - H)))               # (1, 128)
    blin_p = b_lin.reshape(1, 1)                                 # (1, 1)

    kernel = _make_lstm_kernel(TC, B_pad)

    y_pad = pl.pallas_call(
        kernel,
        out_shape=jax.ShapeDtypeStruct((num_chunks, TC, B_pad), jnp.float32),
        grid=(num_chunks,),
        in_specs=[
            pl.BlockSpec((TC, B_pad, 1), lambda i: (i, 0, 0)),   # x time chunk
            pl.BlockSpec((1, GP), lambda i: (0, 0)),             # W_ih row (packed)
            pl.BlockSpec((1, GP), lambda i: (0, 0)),             # bias row (packed)
            pl.BlockSpec((HP, GP), lambda i: (0, 0)),            # W_hh packed
            pl.BlockSpec((1, HP), lambda i: (0, 0)),             # linear weight row
            pl.BlockSpec((1, 1), lambda i: (0, 0)),              # linear bias
        ],
        out_specs=pl.BlockSpec((1, TC, B_pad), lambda i: (i, 0, 0)),
        scratch_shapes=[
            pltpu.VMEM((B_pad, HP), jnp.float32),        # h carry (persists over grid)
            pltpu.VMEM((B_pad, HP), jnp.float32),        # c carry (persists over grid)
            pltpu.VMEM((TC, B_pad, HP), jnp.float32),    # per-chunk h history
        ],
        compiler_params=pltpu.CompilerParams(
            dimension_semantics=("arbitrary",)),         # serial recurrence over chunks
    )(x_tb, w_row, b_row, whh_packed, wlin_p, blin_p)

    # TODO(synk): for batch-heavy workloads on v7x, add a leading 'parallel' batch
    # grid axis to use both TensorCores; omitted here since B is tiny.
    y = y_pad.reshape(T_pad, B_pad)[:T, :B]              # (T, B)
    return jnp.transpose(y, (1, 0))[:, :, None]          # (B, T, 1)


def lstm_reference(x, w_ih, w_hh, b_ih, b_hh, w_lin, b_lin):
    """Pure-JAX reference matching torch.nn.LSTM + Linear semantics."""
    B, T, _ = x.shape

    def step(carry, x_t):
        h, c = carry
        gates = x_t @ w_ih.T + b_ih + h @ w_hh.T + b_hh     # (B, 4H)
        i = jax.nn.sigmoid(gates[:, 0:H])
        f = jax.nn.sigmoid(gates[:, H:2 * H])
        g = jnp.tanh(gates[:, 2 * H:3 * H])
        o = jax.nn.sigmoid(gates[:, 3 * H:4 * H])
        c_new = f * c + i * g
        h_new = o * jnp.tanh(c_new)
        return (h_new, c_new), h_new

    h0 = jnp.zeros((B, H), jnp.float32)
    c0 = jnp.zeros((B, H), jnp.float32)
    _, hs = lax.scan(step, (h0, c0), jnp.transpose(x, (1, 0, 2)))  # (T, B, H)
    hs = jnp.transpose(hs, (1, 0, 2))                              # (B, T, H)
    return hs @ w_lin.T + b_lin


if __name__ == "__main__":
    key = jax.random.PRNGKey(0)
    k_x, k1, k2, k3, k4, k5, k6 = jax.random.split(key, 7)

    B, T = 2, 8

    # deterministic param init (PyTorch-style uniform(-1/sqrt(H), 1/sqrt(H)))
    bound = 1.0 / np.sqrt(H)
    w_ih = jax.random.uniform(k1, (4 * H, INPUT), jnp.float32, -bound, bound)
    w_hh = jax.random.uniform(k2, (4 * H, H), jnp.float32, -bound, bound)
    b_ih = jax.random.uniform(k3, (4 * H,), jnp.float32, -bound, bound)
    b_hh = jax.random.uniform(k4, (4 * H,), jnp.float32, -bound, bound)
    w_lin = jax.random.uniform(k5, (1, H), jnp.float32, -bound, bound)
    b_lin = jax.random.uniform(k6, (1,), jnp.float32, -bound, bound)

    x = jax.random.normal(k_x, (B, T, INPUT), jnp.float32)

    y = lstm_forward(x, w_ih, w_hh, b_ih, b_hh, w_lin, b_lin)
    y = jax.block_until_ready(y)

    y_ref = lstm_reference(x, w_ih, w_hh, b_ih, b_hh, w_lin, b_lin)
    np.testing.assert_allclose(np.asarray(y), np.asarray(y_ref), rtol=1e-5, atol=1e-5)

    print("KERNEL_OK")
</pallas_src>

<mosaic_0001>
module attributes {stable_mosaic.version = 11 : i64} {
  func.func @kernel(%arg0: i32, %arg1: memref<8x8x1xf32, #tpu.memory_space<vmem>>, %arg2: memref<1x512xf32, #tpu.memory_space<vmem>>, %arg3: memref<1x512xf32, #tpu.memory_space<vmem>>, %arg4: memref<128x512xf32, #tpu.memory_space<vmem>>, %arg5: memref<1x128xf32, #tpu.memory_space<vmem>>, %arg6: memref<1x1xf32, #tpu.memory_space<vmem>>, %arg7: memref<1x8x8xf32, #tpu.memory_space<vmem>>, %arg8: memref<8x128xf32, #tpu.memory_space<vmem>>, %arg9: memref<8x128xf32, #tpu.memory_space<vmem>>, %arg10: memref<8x8x128xf32, #tpu.memory_space<vmem>>) attributes {dimension_semantics = [#tpu.dimension_semantics<arbitrary>], iteration_bounds = array<i64: 1>, scalar_prefetch = 0 : i64, scratch_operands = 3 : i64, tpu.core_type = #tpu.core_type<tc>, window_params = [{transform_indices = @transform_0, window_bounds = array<i64: 8, 8, 1>}, {pipeline_mode = #tpu.pipeline_mode<synchronous>, transform_indices = @transform_1, window_bounds = array<i64: 1, 512>}, {pipeline_mode = #tpu.pipeline_mode<synchronous>, transform_indices = @transform_2, window_bounds = array<i64: 1, 512>}, {pipeline_mode = #tpu.pipeline_mode<synchronous>, transform_indices = @transform_3, window_bounds = array<i64: 128, 512>}, {pipeline_mode = #tpu.pipeline_mode<synchronous>, transform_indices = @transform_4, window_bounds = array<i64: 1, 128>}, {pipeline_mode = #tpu.pipeline_mode<synchronous>, transform_indices = @transform_5, window_bounds = array<i64: 1, 1>}, {transform_indices = @transform_6, window_bounds = array<i64: 1, 8, 8>}]} {
    %c0_i32 = arith.constant 0 : i32
    %0 = arith.cmpi eq, %arg0, %c0_i32 : i32
    %1 = arith.extui %0 : i1 to i32
    %c0_i32_0 = arith.constant 0 : i32
    %2 = arith.cmpi ne, %1, %c0_i32_0 : i32
    scf.if %2 {
      %cst_137 = arith.constant 0.000000e+00 : f32
      %382 = vector.broadcast %cst_137 : f32 to vector<8x128xf32>
      %c0_138 = arith.constant 0 : index
      %c0_139 = arith.constant 0 : index
      %383 = vector.load %arg8[%c0_138, %c0_139] : memref<8x128xf32, #tpu.memory_space<vmem>>, vector<8x128xf32>
      tpu.vector_store %arg8[%c0_138, %c0_139], %382 {strides = array<i32>} : memref<8x128xf32, #tpu.memory_space<vmem>>, vector<8x128xf32>,
      %cst_140 = arith.constant 0.000000e+00 : f32
      %384 = vector.broadcast %cst_140 : f32 to vector<8x128xf32>
      %c0_141 = arith.constant 0 : index
      %c0_142 = arith.constant 0 : index
      %385 = vector.load %arg9[%c0_141, %c0_142] : memref<8x128xf32, #tpu.memory_space<vmem>>, vector<8x128xf32>
      tpu.vector_store %arg9[%c0_141, %c0_142], %384 {strides = array<i32>} : memref<8x128xf32, #tpu.memory_space<vmem>>, vector<8x128xf32>,
    } else {
    }
    %c0 = arith.constant 0 : index
    %c0_1 = arith.constant 0 : index
    %3 = vector.load %arg4[%c0, %c0_1] : memref<128x512xf32, #tpu.memory_space<vmem>>, vector<128x512xf32>
    %c0_2 = arith.constant 0 : index
    %c0_3 = arith.constant 0 : index
    %4 = vector.load %arg2[%c0_2, %c0_3] : memref<1x512xf32, #tpu.memory_space<vmem>>, vector<1x512xf32>
    %c0_4 = arith.constant 0 : index
    %c0_5 = arith.constant 0 : index
    %5 = vector.load %arg3[%c0_4, %c0_5] : memref<1x512xf32, #tpu.memory_space<vmem>>, vector<1x512xf32>
    %c0_6 = arith.constant 0 : index
    %c0_7 = arith.constant 0 : index
    %6 = vector.load %arg8[%c0_6, %c0_7] : memref<8x128xf32, #tpu.memory_space<vmem>>, vector<8x128xf32>
    %c0_8 = arith.constant 0 : index
    %c0_9 = arith.constant 0 : index
    %7 = vector.load %arg9[%c0_8, %c0_9] : memref<8x128xf32, #tpu.memory_space<vmem>>, vector<8x128xf32>
    %c0_i32_10 = arith.constant 0 : i32
    %8 = arith.index_cast %c0_i32_10 : i32 to index
    %c0_11 = arith.constant 0 : index
    %c0_12 = arith.constant 0 : index
    %9 = vector.load %arg1[%8, %c0_11, %c0_12] : memref<8x8x1xf32, #tpu.memory_space<vmem>>, vector<1x8x1xf32>
    %10 = vector.shape_cast %9 : vector<1x8x1xf32> to vector<8x1xf32>
    %11 = vector.broadcast %10 : vector<8x1xf32> to vector<8x512xf32>
    %12 = vector.broadcast %4 : vector<1x512xf32> to vector<8x512xf32>
    %13 = arith.mulf %11, %12 : vector<8x512xf32>
    %14 = vector.broadcast %5 : vector<1x512xf32> to vector<8x512xf32>
    %15 = arith.addf %13, %14 : vector<8x512xf32>
    %cst = arith.constant dense<0.000000e+00> : vector<8x512xf32>
    %16 = tpu.matmul %6, %3, %cst {dimension_numbers = #tpu.dot_dimension_numbers<[1], [0], [0], [1], [0, 0, 1, 1], [], []>} : vector<8x128xf32>, vector<128x512xf32>, vector<8x512xf32> -> vector<8x512xf32>
    %17 = arith.addf %15, %16 : vector<8x512xf32>
    %18 = vector.extract_strided_slice %17 {offsets = [0, 0], sizes = [8, 128], strides = [1, 1]} : vector<8x512xf32> to vector<8x128xf32>
    %cst_13 = arith.constant 5.000000e-01 : f32
    %19 = vector.broadcast %cst_13 : f32 to vector<8x128xf32>
    %20 = arith.mulf %19, %18 : vector<8x128xf32>
    %21 = math.tanh %20 : vector<8x128xf32>
    %cst_14 = arith.constant 5.000000e-01 : f32
    %22 = vector.broadcast %cst_14 : f32 to vector<8x128xf32>
    %23 = arith.mulf %22, %21 : vector<8x128xf32>
    %cst_15 = arith.constant 5.000000e-01 : f32
    %24 = vector.broadcast %cst_15 : f32 to vector<8x128xf32>
    %25 = arith.addf %23, %24 : vector<8x128xf32>
    %26 = vector.extract_strided_slice %17 {offsets = [0, 128], sizes = [8, 128], strides = [1, 1]} : vector<8x512xf32> to vector<8x128xf32>
    %cst_16 = arith.constant 5.000000e-01 : f32
    %27 = vector.broadcast %cst_16 : f32 to vector<8x128xf32>
    %28 = arith.mulf %27, %26 : vector<8x128xf32>
    %29 = math.tanh %28 : vector<8x128xf32>
    %cst_17 = arith.constant 5.000000e-01 : f32
    %30 = vector.broadcast %cst_17 : f32 to vector<8x128xf32>
    %31 = arith.mulf %30, %29 : vector<8x128xf32>
    %cst_18 = arith.constant 5.000000e-01 : f32
    %32 = vector.broadcast %cst_18 : f32 to vector<8x128xf32>
    %33 = arith.addf %31, %32 : vector<8x128xf32>
    %34 = vector.extract_strided_slice %17 {offsets = [0, 256], sizes = [8, 128], strides = [1, 1]} : vector<8x512xf32> to vector<8x128xf32>
    %35 = math.tanh %34 : vector<8x128xf32>
    %36 = vector.extract_strided_slice %17 {offsets = [0, 384], sizes = [8, 128], strides = [1, 1]} : vector<8x512xf32> to vector<8x128xf32>
    %cst_19 = arith.constant 5.000000e-01 : f32
    %37 = vector.broadcast %cst_19 : f32 to vector<8x128xf32>
    %38 = arith.mulf %37, %36 : vector<8x128xf32>
    %39 = math.tanh %38 : vector<8x128xf32>
    %cst_20 = arith.constant 5.000000e-01 : f32
    %40 = vector.broadcast %cst_20 : f32 to vector<8x128xf32>
    %41 = arith.mulf %40, %39 : vector<8x128xf32>
    %cst_21 = arith.constant 5.000000e-01 : f32
    %42 = vector.broadcast %cst_21 : f32 to vector<8x128xf32>
    %43 = arith.addf %41, %42 : vector<8x128xf32>
    %44 = arith.mulf %33, %7 : vector<8x128xf32>
    %45 = arith.mulf %25, %35 : vector<8x128xf32>
    %46 = arith.addf %44, %45 : vector<8x128xf32>
    %47 = math.tanh %46 : vector<8x128xf32>
    %48 = arith.mulf %43, %47 : vector<8x128xf32>
    %49 = arith.index_cast %c0_i32_10 : i32 to index
    %c0_22 = arith.constant 0 : index
    %c0_23 = arith.constant 0 : index
    %50 = vector.load %arg10[%49, %c0_22, %c0_23] : memref<8x8x128xf32, #tpu.memory_space<vmem>>, vector<1x8x128xf32>
    %51 = vector.shape_cast %50 : vector<1x8x128xf32> to vector<8x128xf32>
    %52 = vector.shape_cast %48 : vector<8x128xf32> to vector<1x8x128xf32>
    tpu.vector_store %arg10[%49, %c0_22, %c0_23], %52 {strides = array<i32>} : memref<8x8x128xf32, #tpu.memory_space<vmem>>, vector<1x8x128xf32>,
    %c1_i32 = arith.constant 1 : i32
    %53 = arith.index_cast %c1_i32 : i32 to index
    %c0_24 = arith.constant 0 : index
    %c0_25 = arith.constant 0 : index
    %54 = vector.load %arg1[%53, %c0_24, %c0_25] : memref<8x8x1xf32, #tpu.memory_space<vmem>>, vector<1x8x1xf32>
    %55 = vector.shape_cast %54 : vector<1x8x1xf32> to vector<8x1xf32>
    %56 = vector.broadcast %55 : vector<8x1xf32> to vector<8x512xf32>
    %57 = vector.broadcast %4 : vector<1x512xf32> to vector<8x512xf32>
    %58 = arith.mulf %56, %57 : vector<8x512xf32>
    %59 = vector.broadcast %5 : vector<1x512xf32> to vector<8x512xf32>
    %60 = arith.addf %58, %59 : vector<8x512xf32>
    %cst_26 = arith.constant dense<0.000000e+00> : vector<8x512xf32>
    %61 = tpu.matmul %48, %3, %cst_26 {dimension_numbers = #tpu.dot_dimension_numbers<[1], [0], [0], [1], [0, 0, 1, 1], [], []>} : vector<8x128xf32>, vector<128x512xf32>, vector<8x512xf32> -> vector<8x512xf32>
    %62 = arith.addf %60, %61 : vector<8x512xf32>
    %63 = vector.extract_strided_slice %62 {offsets = [0, 0], sizes = [8, 128], strides = [1, 1]} : vector<8x512xf32> to vector<8x128xf32>
    %cst_27 = arith.constant 5.000000e-01 : f32
    %64 = vector.broadcast %cst_27 : f32 to vector<8x128xf32>
    %65 = arith.mulf %64, %63 : vector<8x128xf32>
    %66 = math.tanh %65 : vector<8x128xf32>
    %cst_28 = arith.constant 5.000000e-01 : f32
    %67 = vector.broadcast %cst_28 : f32 to vector<8x128xf32>
    %68 = arith.mulf %67, %66 : vector<8x128xf32>
    %cst_29 = arith.constant 5.000000e-01 : f32
    %69 = vector.broadcast %cst_29 : f32 to vector<8x128xf32>
    %70 = arith.addf %68, %69 : vector<8x128xf32>
    %71 = vector.extract_strided_slice %62 {offsets = [0, 128], sizes = [8, 128], strides = [1, 1]} : vector<8x512xf32> to vector<8x128xf32>
    %cst_30 = arith.constant 5.000000e-01 : f32
    %72 = vector.broadcast %cst_30 : f32 to vector<8x128xf32>
    %73 = arith.mulf %72, %71 : vector<8x128xf32>
    %74 = math.tanh %73 : vector<8x128xf32>
    %cst_31 = arith.constant 5.000000e-01 : f32
    %75 = vector.broadcast %cst_31 : f32 to vector<8x128xf32>
    %76 = arith.mulf %75, %74 : vector<8x128xf32>
    %cst_32 = arith.constant 5.000000e-01 : f32
    %77 = vector.broadcast %cst_32 : f32 to vector<8x128xf32>
    %78 = arith.addf %76, %77 : vector<8x128xf32>
    %79 = vector.extract_strided_slice %62 {offsets = [0, 256], sizes = [8, 128], strides = [1, 1]} : vector<8x512xf32> to vector<8x128xf32>
    %80 = math.tanh %79 : vector<8x128xf32>
    %81 = vector.extract_strided_slice %62 {offsets = [0, 384], sizes = [8, 128], strides = [1, 1]} : vector<8x512xf32> to vector<8x128xf32>
    %cst_33 = arith.constant 5.000000e-01 : f32
    %82 = vector.broadcast %cst_33 : f32 to vector<8x128xf32>
    %83 = arith.mulf %82, %81 : vector<8x128xf32>
    %84 = math.tanh %83 : vector<8x128xf32>
    %cst_34 = arith.constant 5.000000e-01 : f32
    %85 = vector.broadcast %cst_34 : f32 to vector<8x128xf32>
    %86 = arith.mulf %85, %84 : vector<8x128xf32>
    %cst_35 = arith.constant 5.000000e-01 : f32
    %87 = vector.broadcast %cst_35 : f32 to vector<8x128xf32>
    %88 = arith.addf %86, %87 : vector<8x128xf32>
    %89 = arith.mulf %78, %46 : vector<8x128xf32>
    %90 = arith.mulf %70, %80 : vector<8x128xf32>
    %91 = arith.addf %89, %90 : vector<8x128xf32>
    %92 = math.tanh %91 : vector<8x128xf32>
    %93 = arith.mulf %88, %92 : vector<8x128xf32>
    %94 = arith.index_cast %c1_i32 : i32 to index
    %c0_36 = arith.constant 0 : index
    %c0_37 = arith.constant 0 : index
    %95 = vector.load %arg10[%94, %c0_36, %c0_37] : memref<8x8x128xf32, #tpu.memory_space<vmem>>, vector<1x8x128xf32>
    %96 = vector.shape_cast %95 : vector<1x8x128xf32> to vector<8x128xf32>
    %97 = vector.shape_cast %93 : vector<8x128xf32> to vector<1x8x128xf32>
    tpu.vector_store %arg10[%94, %c0_36, %c0_37], %97 {strides = array<i32>} : memref<8x8x128xf32, #tpu.memory_space<vmem>>, vector<1x8x128xf32>,
    %c2_i32 = arith.constant 2 : i32
    %98 = arith.index_cast %c2_i32 : i32 to index
    %c0_38 = arith.constant 0 : index
    %c0_39 = arith.constant 0 : index
    %99 = vector.load %arg1[%98, %c0_38, %c0_39] : memref<8x8x1xf32, #tpu.memory_space<vmem>>, vector<1x8x1xf32>
    %100 = vector.shape_cast %99 : vector<1x8x1xf32> to vector<8x1xf32>
    %101 = vector.broadcast %100 : vector<8x1xf32> to vector<8x512xf32>
    %102 = vector.broadcast %4 : vector<1x512xf32> to vector<8x512xf32>
    %103 = arith.mulf %101, %102 : vector<8x512xf32>
    %104 = vector.broadcast %5 : vector<1x512xf32> to vector<8x512xf32>
    %105 = arith.addf %103, %104 : vector<8x512xf32>
    %cst_40 = arith.constant dense<0.000000e+00> : vector<8x512xf32>
    %106 = tpu.matmul %93, %3, %cst_40 {dimension_numbers = #tpu.dot_dimension_numbers<[1], [0], [0], [1], [0, 0, 1, 1], [], []>} : vector<8x128xf32>, vector<128x512xf32>, vector<8x512xf32> -> vector<8x512xf32>
    %107 = arith.addf %105, %106 : vector<8x512xf32>
    %108 = vector.extract_strided_slice %107 {offsets = [0, 0], sizes = [8, 128], strides = [1, 1]} : vector<8x512xf32> to vector<8x128xf32>
    %cst_41 = arith.constant 5.000000e-01 : f32
    %109 = vector.broadcast %cst_41 : f32 to vector<8x128xf32>
    %110 = arith.mulf %109, %108 : vector<8x128xf32>
    %111 = math.tanh %110 : vector<8x128xf32>
    %cst_42 = arith.constant 5.000000e-01 : f32
    %112 = vector.broadcast %cst_42 : f32 to vector<8x128xf32>
    %113 = arith.mulf %112, %111 : vector<8x128xf32>
    %cst_43 = arith.constant 5.000000e-01 : f32
    %114 = vector.broadcast %cst_43 : f32 to vector<8x128xf32>
    %115 = arith.addf %113, %114 : vector<8x128xf32>
    %116 = vector.extract_strided_slice %107 {offsets = [0, 128], sizes = [8, 128], strides = [1, 1]} : vector<8x512xf32> to vector<8x128xf32>
    %cst_44 = arith.constant 5.000000e-01 : f32
    %117 = vector.broadcast %cst_44 : f32 to vector<8x128xf32>
    %118 = arith.mulf %117, %116 : vector<8x128xf32>
    %119 = math.tanh %118 : vector<8x128xf32>
    %cst_45 = arith.constant 5.000000e-01 : f32
    %120 = vector.broadcast %cst_45 : f32 to vector<8x128xf32>
    %121 = arith.mulf %120, %119 : vector<8x128xf32>
    %cst_46 = arith.constant 5.000000e-01 : f32
    %122 = vector.broadcast %cst_46 : f32 to vector<8x128xf32>
    %123 = arith.addf %121, %122 : vector<8x128xf32>
    %124 = vector.extract_strided_slice %107 {offsets = [0, 256], sizes = [8, 128], strides = [1, 1]} : vector<8x512xf32> to vector<8x128xf32>
    %125 = math.tanh %124 : vector<8x128xf32>
    %126 = vector.extract_strided_slice %107 {offsets = [0, 384], sizes = [8, 128], strides = [1, 1]} : vector<8x512xf32> to vector<8x128xf32>
    %cst_47 = arith.constant 5.000000e-01 : f32
    %127 = vector.broadcast %cst_47 : f32 to vector<8x128xf32>
    %128 = arith.mulf %127, %126 : vector<8x128xf32>
    %129 = math.tanh %128 : vector<8x128xf32>
    %cst_48 = arith.constant 5.000000e-01 : f32
    %130 = vector.broadcast %cst_48 : f32 to vector<8x128xf32>
    %131 = arith.mulf %130, %129 : vector<8x128xf32>
    %cst_49 = arith.constant 5.000000e-01 : f32
    %132 = vector.broadcast %cst_49 : f32 to vector<8x128xf32>
    %133 = arith.addf %131, %132 : vector<8x128xf32>
    %134 = arith.mulf %123, %91 : vector<8x128xf32>
    %135 = arith.mulf %115, %125 : vector<8x128xf32>
    %136 = arith.addf %134, %135 : vector<8x128xf32>
    %137 = math.tanh %136 : vector<8x128xf32>
    %138 = arith.mulf %133, %137 : vector<8x128xf32>
    %139 = arith.index_cast %c2_i32 : i32 to index
    %c0_50 = arith.constant 0 : index
    %c0_51 = arith.constant 0 : index
    %140 = vector.load %arg10[%139, %c0_50, %c0_51] : memref<8x8x128xf32, #tpu.memory_space<vmem>>, vector<1x8x128xf32>
    %141 = vector.shape_cast %140 : vector<1x8x128xf32> to vector<8x128xf32>
    %142 = vector.shape_cast %138 : vector<8x128xf32> to vector<1x8x128xf32>
    tpu.vector_store %arg10[%139, %c0_50, %c0_51], %142 {strides = array<i32>} : memref<8x8x128xf32, #tpu.memory_space<vmem>>, vector<1x8x128xf32>,
    %c3_i32 = arith.constant 3 : i32
    %143 = arith.index_cast %c3_i32 : i32 to index
    %c0_52 = arith.constant 0 : index
    %c0_53 = arith.constant 0 : index
    %144 = vector.load %arg1[%143, %c0_52, %c0_53] : memref<8x8x1xf32, #tpu.memory_space<vmem>>, vector<1x8x1xf32>
    %145 = vector.shape_cast %144 : vector<1x8x1xf32> to vector<8x1xf32>
    %146 = vector.broadcast %145 : vector<8x1xf32> to vector<8x512xf32>
    %147 = vector.broadcast %4 : vector<1x512xf32> to vector<8x512xf32>
    %148 = arith.mulf %146, %147 : vector<8x512xf32>
    %149 = vector.broadcast %5 : vector<1x512xf32> to vector<8x512xf32>
    %150 = arith.addf %148, %149 : vector<8x512xf32>
    %cst_54 = arith.constant dense<0.000000e+00> : vector<8x512xf32>
    %151 = tpu.matmul %138, %3, %cst_54 {dimension_numbers = #tpu.dot_dimension_numbers<[1], [0], [0], [1], [0, 0, 1, 1], [], []>} : vector<8x128xf32>, vector<128x512xf32>, vector<8x512xf32> -> vector<8x512xf32>
    %152 = arith.addf %150, %151 : vector<8x512xf32>
    %153 = vector.extract_strided_slice %152 {offsets = [0, 0], sizes = [8, 128], strides = [1, 1]} : vector<8x512xf32> to vector<8x128xf32>
    %cst_55 = arith.constant 5.000000e-01 : f32
    %154 = vector.broadcast %cst_55 : f32 to vector<8x128xf32>
    %155 = arith.mulf %154, %153 : vector<8x128xf32>
    %156 = math.tanh %155 : vector<8x128xf32>
    %cst_56 = arith.constant 5.000000e-01 : f32
    %157 = vector.broadcast %cst_56 : f32 to vector<8x128xf32>
    %158 = arith.mulf %157, %156 : vector<8x128xf32>
    %cst_57 = arith.constant 5.000000e-01 : f32
    %159 = vector.broadcast %cst_57 : f32 to vector<8x128xf32>
    %160 = arith.addf %158, %159 : vector<8x128xf32>
    %161 = vector.extract_strided_slice %152 {offsets = [0, 128], sizes = [8, 128], strides = [1, 1]} : vector<8x512xf32> to vector<8x128xf32>
    %cst_58 = arith.constant 5.000000e-01 : f32
    %162 = vector.broadcast %cst_58 : f32 to vector<8x128xf32>
    %163 = arith.mulf %162, %161 : vector<8x128xf32>
    %164 = math.tanh %163 : vector<8x128xf32>
    %cst_59 = arith.constant 5.000000e-01 : f32
    %165 = vector.broadcast %cst_59 : f32 to vector<8x128xf32>
    %166 = arith.mulf %165, %164 : vector<8x128xf32>
    %cst_60 = arith.constant 5.000000e-01 : f32
    %167 = vector.broadcast %cst_60 : f32 to vector<8x128xf32>
    %168 = arith.addf %166, %167 : vector<8x128xf32>
    %169 = vector.extract_strided_slice %152 {offsets = [0, 256], sizes = [8, 128], strides = [1, 1]} : vector<8x512xf32> to vector<8x128xf32>
    %170 = math.tanh %169 : vector<8x128xf32>
    %171 = vector.extract_strided_slice %152 {offsets = [0, 384], sizes = [8, 128], strides = [1, 1]} : vector<8x512xf32> to vector<8x128xf32>
    %cst_61 = arith.constant 5.000000e-01 : f32
    %172 = vector.broadcast %cst_61 : f32 to vector<8x128xf32>
    %173 = arith.mulf %172, %171 : vector<8x128xf32>
    %174 = math.tanh %173 : vector<8x128xf32>
    %cst_62 = arith.constant 5.000000e-01 : f32
    %175 = vector.broadcast %cst_62 : f32 to vector<8x128xf32>
    %176 = arith.mulf %175, %174 : vector<8x128xf32>
    %cst_63 = arith.constant 5.000000e-01 : f32
    %177 = vector.broadcast %cst_63 : f32 to vector<8x128xf32>
    %178 = arith.addf %176, %177 : vector<8x128xf32>
    %179 = arith.mulf %168, %136 : vector<8x128xf32>
    %180 = arith.mulf %160, %170 : vector<8x128xf32>
    %181 = arith.addf %179, %180 : vector<8x128xf32>
    %182 = math.tanh %181 : vector<8x128xf32>
    %183 = arith.mulf %178, %182 : vector<8x128xf32>
    %184 = arith.index_cast %c3_i32 : i32 to index
    %c0_64 = arith.constant 0 : index
    %c0_65 = arith.constant 0 : index
    %185 = vector.load %arg10[%184, %c0_64, %c0_65] : memref<8x8x128xf32, #tpu.memory_space<vmem>>, vector<1x8x128xf32>
    %186 = vector.shape_cast %185 : vector<1x8x128xf32> to vector<8x128xf32>
    %187 = vector.shape_cast %183 : vector<8x128xf32> to vector<1x8x128xf32>
    tpu.vector_store %arg10[%184, %c0_64, %c0_65], %187 {strides = array<i32>} : memref<8x8x128xf32, #tpu.memory_space<vmem>>, vector<1x8x128xf32>,
    %c4_i32 = arith.constant 4 : i32
    %188 = arith.index_cast %c4_i32 : i32 to index
    %c0_66 = arith.constant 0 : index
    %c0_67 = arith.constant 0 : index
    %189 = vector.load %arg1[%188, %c0_66, %c0_67] : memref<8x8x1xf32, #tpu.memory_space<vmem>>, vector<1x8x1xf32>
    %190 = vector.shape_cast %189 : vector<1x8x1xf32> to vector<8x1xf32>
    %191 = vector.broadcast %190 : vector<8x1xf32> to vector<8x512xf32>
    %192 = vector.broadcast %4 : vector<1x512xf32> to vector<8x512xf32>
    %193 = arith.mulf %191, %192 : vector<8x512xf32>
    %194 = vector.broadcast %5 : vector<1x512xf32> to vector<8x512xf32>
    %195 = arith.addf %193, %194 : vector<8x512xf32>
    %cst_68 = arith.constant dense<0.000000e+00> : vector<8x512xf32>
    %196 = tpu.matmul %183, %3, %cst_68 {dimension_numbers = #tpu.dot_dimension_numbers<[1], [0], [0], [1], [0, 0, 1, 1], [], []>} : vector<8x128xf32>, vector<128x512xf32>, vector<8x512xf32> -> vector<8x512xf32>
    %197 = arith.addf %195, %196 : vector<8x512xf32>
    %198 = vector.extract_strided_slice %197 {offsets = [0, 0], sizes = [8, 128], strides = [1, 1]} : vector<8x512xf32> to vector<8x128xf32>
    %cst_69 = arith.constant 5.000000e-01 : f32
    %199 = vector.broadcast %cst_69 : f32 to vector<8x128xf32>
    %200 = arith.mulf %199, %198 : vector<8x128xf32>
    %201 = math.tanh %200 : vector<8x128xf32>
    %cst_70 = arith.constant 5.000000e-01 : f32
    %202 = vector.broadcast %cst_70 : f32 to vector<8x128xf32>
    %203 = arith.mulf %202, %201 : vector<8x128xf32>
    %cst_71 = arith.constant 5.000000e-01 : f32
    %204 = vector.broadcast %cst_71 : f32 to vector<8x128xf32>
    %205 = arith.addf %203, %204 : vector<8x128xf32>
    %206 = vector.extract_strided_slice %197 {offsets = [0, 128], sizes = [8, 128], strides = [1, 1]} : vector<8x512xf32> to vector<8x128xf32>
    %cst_72 = arith.constant 5.000000e-01 : f32
    %207 = vector.broadcast %cst_72 : f32 to vector<8x128xf32>
    %208 = arith.mulf %207, %206 : vector<8x128xf32>
    %209 = math.tanh %208 : vector<8x128xf32>
    %cst_73 = arith.constant 5.000000e-01 : f32
    %210 = vector.broadcast %cst_73 : f32 to vector<8x128xf32>
    %211 = arith.mulf %210, %209 : vector<8x128xf32>
    %cst_74 = arith.constant 5.000000e-01 : f32
    %212 = vector.broadcast %cst_74 : f32 to vector<8x128xf32>
    %213 = arith.addf %211, %212 : vector<8x128xf32>
    %214 = vector.extract_strided_slice %197 {offsets = [0, 256], sizes = [8, 128], strides = [1, 1]} : vector<8x512xf32> to vector<8x128xf32>
    %215 = math.tanh %214 : vector<8x128xf32>
    %216 = vector.extract_strided_slice %197 {offsets = [0, 384], sizes = [8, 128], strides = [1, 1]} : vector<8x512xf32> to vector<8x128xf32>
    %cst_75 = arith.constant 5.000000e-01 : f32
    %217 = vector.broadcast %cst_75 : f32 to vector<8x128xf32>
    %218 = arith.mulf %217, %216 : vector<8x128xf32>
    %219 = math.tanh %218 : vector<8x128xf32>
    %cst_76 = arith.constant 5.000000e-01 : f32
    %220 = vector.broadcast %cst_76 : f32 to vector<8x128xf32>
    %221 = arith.mulf %220, %219 : vector<8x128xf32>
    %cst_77 = arith.constant 5.000000e-01 : f32
    %222 = vector.broadcast %cst_77 : f32 to vector<8x128xf32>
    %223 = arith.addf %221, %222 : vector<8x128xf32>
    %224 = arith.mulf %213, %181 : vector<8x128xf32>
    %225 = arith.mulf %205, %215 : vector<8x128xf32>
    %226 = arith.addf %224, %225 : vector<8x128xf32>
    %227 = math.tanh %226 : vector<8x128xf32>
    %228 = arith.mulf %223, %227 : vector<8x128xf32>
    %229 = arith.index_cast %c4_i32 : i32 to index
    %c0_78 = arith.constant 0 : index
    %c0_79 = arith.constant 0 : index
    %230 = vector.load %arg10[%229, %c0_78, %c0_79] : memref<8x8x128xf32, #tpu.memory_space<vmem>>, vector<1x8x128xf32>
    %231 = vector.shape_cast %230 : vector<1x8x128xf32> to vector<8x128xf32>
    %232 = vector.shape_cast %228 : vector<8x128xf32> to vector<1x8x128xf32>
    tpu.vector_store %arg10[%229, %c0_78, %c0_79], %232 {strides = array<i32>} : memref<8x8x128xf32, #tpu.memory_space<vmem>>, vector<1x8x128xf32>,
    %c5_i32 = arith.constant 5 : i32
    %233 = arith.index_cast %c5_i32 : i32 to index
    %c0_80 = arith.constant 0 : index
    %c0_81 = arith.constant 0 : index
    %234 = vector.load %arg1[%233, %c0_80, %c0_81] : memref<8x8x1xf32, #tpu.memory_space<vmem>>, vector<1x8x1xf32>
    %235 = vector.shape_cast %234 : vector<1x8x1xf32> to vector<8x1xf32>
    %236 = vector.broadcast %235 : vector<8x1xf32> to vector<8x512xf32>
    %237 = vector.broadcast %4 : vector<1x512xf32> to vector<8x512xf32>
    %238 = arith.mulf %236, %237 : vector<8x512xf32>
    %239 = vector.broadcast %5 : vector<1x512xf32> to vector<8x512xf32>
    %240 = arith.addf %238, %239 : vector<8x512xf32>
    %cst_82 = arith.constant dense<0.000000e+00> : vector<8x512xf32>
    %241 = tpu.matmul %228, %3, %cst_82 {dimension_numbers = #tpu.dot_dimension_numbers<[1], [0], [0], [1], [0, 0, 1, 1], [], []>} : vector<8x128xf32>, vector<128x512xf32>, vector<8x512xf32> -> vector<8x512xf32>
    %242 = arith.addf %240, %241 : vector<8x512xf32>
    %243 = vector.extract_strided_slice %242 {offsets = [0, 0], sizes = [8, 128], strides = [1, 1]} : vector<8x512xf32> to vector<8x128xf32>
    %cst_83 = arith.constant 5.000000e-01 : f32
    %244 = vector.broadcast %cst_83 : f32 to vector<8x128xf32>
    %245 = arith.mulf %244, %243 : vector<8x128xf32>
    %246 = math.tanh %245 : vector<8x128xf32>
    %cst_84 = arith.constant 5.000000e-01 : f32
    %247 = vector.broadcast %cst_84 : f32 to vector<8x128xf32>
    %248 = arith.mulf %247, %246 : vector<8x128xf32>
    %cst_85 = arith.constant 5.000000e-01 : f32
    %249 = vector.broadcast %cst_85 : f32 to vector<8x128xf32>
    %250 = arith.addf %248, %249 : vector<8x128xf32>
    %251 = vector.extract_strided_slice %242 {offsets = [0, 128], sizes = [8, 128], strides = [1, 1]} : vector<8x512xf32> to vector<8x128xf32>
    %cst_86 = arith.constant 5.000000e-01 : f32
    %252 = vector.broadcast %cst_86 : f32 to vector<8x128xf32>
    %253 = arith.mulf %252, %251 : vector<8x128xf32>
    %254 = math.tanh %253 : vector<8x128xf32>
    %cst_87 = arith.constant 5.000000e-01 : f32
    %255 = vector.broadcast %cst_87 : f32 to vector<8x128xf32>
    %256 = arith.mulf %255, %254 : vector<8x128xf32>
    %cst_88 = arith.constant 5.000000e-01 : f32
    %257 = vector.broadcast %cst_88 : f32 to vector<8x128xf32>
    %258 = arith.addf %256, %257 : vector<8x128xf32>
    %259 = vector.extract_strided_slice %242 {offsets = [0, 256], sizes = [8, 128], strides = [1, 1]} : vector<8x512xf32> to vector<8x128xf32>
    %260 = math.tanh %259 : vector<8x128xf32>
    %261 = vector.extract_strided_slice %242 {offsets = [0, 384], sizes = [8, 128], strides = [1, 1]} : vector<8x512xf32> to vector<8x128xf32>
    %cst_89 = arith.constant 5.000000e-01 : f32
    %262 = vector.broadcast %cst_89 : f32 to vector<8x128xf32>
    %263 = arith.mulf %262, %261 : vector<8x128xf32>
    %264 = math.tanh %263 : vector<8x128xf32>
    %cst_90 = arith.constant 5.000000e-01 : f32
    %265 = vector.broadcast %cst_90 : f32 to vector<8x128xf32>
    %266 = arith.mulf %265, %264 : vector<8x128xf32>
    %cst_91 = arith.constant 5.000000e-01 : f32
    %267 = vector.broadcast %cst_91 : f32 to vector<8x128xf32>
    %268 = arith.addf %266, %267 : vector<8x128xf32>
    %269 = arith.mulf %258, %226 : vector<8x128xf32>
    %270 = arith.mulf %250, %260 : vector<8x128xf32>
    %271 = arith.addf %269, %270 : vector<8x128xf32>
    %272 = math.tanh %271 : vector<8x128xf32>
    %273 = arith.mulf %268, %272 : vector<8x128xf32>
    %274 = arith.index_cast %c5_i32 : i32 to index
    %c0_92 = arith.constant 0 : index
    %c0_93 = arith.constant 0 : index
    %275 = vector.load %arg10[%274, %c0_92, %c0_93] : memref<8x8x128xf32, #tpu.memory_space<vmem>>, vector<1x8x128xf32>
    %276 = vector.shape_cast %275 : vector<1x8x128xf32> to vector<8x128xf32>
    %277 = vector.shape_cast %273 : vector<8x128xf32> to vector<1x8x128xf32>
    tpu.vector_store %arg10[%274, %c0_92, %c0_93], %277 {strides = array<i32>} : memref<8x8x128xf32, #tpu.memory_space<vmem>>, vector<1x8x128xf32>,
    %c6_i32 = arith.constant 6 : i32
    %278 = arith.index_cast %c6_i32 : i32 to index
    %c0_94 = arith.constant 0 : index
    %c0_95 = arith.constant 0 : index
    %279 = vector.load %arg1[%278, %c0_94, %c0_95] : memref<8x8x1xf32, #tpu.memory_space<vmem>>, vector<1x8x1xf32>
    %280 = vector.shape_cast %279 : vector<1x8x1xf32> to vector<8x1xf32>
    %281 = vector.broadcast %280 : vector<8x1xf32> to vector<8x512xf32>
    %282 = vector.broadcast %4 : vector<1x512xf32> to vector<8x512xf32>
    %283 = arith.mulf %281, %282 : vector<8x512xf32>
    %284 = vector.broadcast %5 : vector<1x512xf32> to vector<8x512xf32>
    %285 = arith.addf %283, %284 : vector<8x512xf32>
    %cst_96 = arith.constant dense<0.000000e+00> : vector<8x512xf32>
    %286 = tpu.matmul %273, %3, %cst_96 {dimension_numbers = #tpu.dot_dimension_numbers<[1], [0], [0], [1], [0, 0, 1, 1], [], []>} : vector<8x128xf32>, vector<128x512xf32>, vector<8x512xf32> -> vector<8x512xf32>
    %287 = arith.addf %285, %286 : vector<8x512xf32>
    %288 = vector.extract_strided_slice %287 {offsets = [0, 0], sizes = [8, 128], strides = [1, 1]} : vector<8x512xf32> to vector<8x128xf32>
    %cst_97 = arith.constant 5.000000e-01 : f32
    %289 = vector.broadcast %cst_97 : f32 to vector<8x128xf32>
    %290 = arith.mulf %289, %288 : vector<8x128xf32>
    %291 = math.tanh %290 : vector<8x128xf32>
    %cst_98 = arith.constant 5.000000e-01 : f32
    %292 = vector.broadcast %cst_98 : f32 to vector<8x128xf32>
    %293 = arith.mulf %292, %291 : vector<8x128xf32>
    %cst_99 = arith.constant 5.000000e-01 : f32
    %294 = vector.broadcast %cst_99 : f32 to vector<8x128xf32>
    %295 = arith.addf %293, %294 : vector<8x128xf32>
    %296 = vector.extract_strided_slice %287 {offsets = [0, 128], sizes = [8, 128], strides = [1, 1]} : vector<8x512xf32> to vector<8x128xf32>
    %cst_100 = arith.constant 5.000000e-01 : f32
    %297 = vector.broadcast %cst_100 : f32 to vector<8x128xf32>
    %298 = arith.mulf %297, %296 : vector<8x128xf32>
    %299 = math.tanh %298 : vector<8x128xf32>
    %cst_101 = arith.constant 5.000000e-01 : f32
    %300 = vector.broadcast %cst_101 : f32 to vector<8x128xf32>
    %301 = arith.mulf %300, %299 : vector<8x128xf32>
    %cst_102 = arith.constant 5.000000e-01 : f32
    %302 = vector.broadcast %cst_102 : f32 to vector<8x128xf32>
    %303 = arith.addf %301, %302 : vector<8x128xf32>
    %304 = vector.extract_strided_slice %287 {offsets = [0, 256], sizes = [8, 128], strides = [1, 1]} : vector<8x512xf32> to vector<8x128xf32>
    %305 = math.tanh %304 : vector<8x128xf32>
    %306 = vector.extract_strided_slice %287 {offsets = [0, 384], sizes = [8, 128], strides = [1, 1]} : vector<8x512xf32> to vector<8x128xf32>
    %cst_103 = arith.constant 5.000000e-01 : f32
    %307 = vector.broadcast %cst_103 : f32 to vector<8x128xf32>
    %308 = arith.mulf %307, %306 : vector<8x128xf32>
    %309 = math.tanh %308 : vector<8x128xf32>
    %cst_104 = arith.constant 5.000000e-01 : f32
    %310 = vector.broadcast %cst_104 : f32 to vector<8x128xf32>
    %311 = arith.mulf %310, %309 : vector<8x128xf32>
    %cst_105 = arith.constant 5.000000e-01 : f32
    %312 = vector.broadcast %cst_105 : f32 to vector<8x128xf32>
    %313 = arith.addf %311, %312 : vector<8x128xf32>
    %314 = arith.mulf %303, %271 : vector<8x128xf32>
    %315 = arith.mulf %295, %305 : vector<8x128xf32>
    %316 = arith.addf %314, %315 : vector<8x128xf32>
    %317 = math.tanh %316 : vector<8x128xf32>
    %318 = arith.mulf %313, %317 : vector<8x128xf32>
    %319 = arith.index_cast %c6_i32 : i32 to index
    %c0_106 = arith.constant 0 : index
    %c0_107 = arith.constant 0 : index
    %320 = vector.load %arg10[%319, %c0_106, %c0_107] : memref<8x8x128xf32, #tpu.memory_space<vmem>>, vector<1x8x128xf32>
    %321 = vector.shape_cast %320 : vector<1x8x128xf32> to vector<8x128xf32>
    %322 = vector.shape_cast %318 : vector<8x128xf32> to vector<1x8x128xf32>
    tpu.vector_store %arg10[%319, %c0_106, %c0_107], %322 {strides = array<i32>} : memref<8x8x128xf32, #tpu.memory_space<vmem>>, vector<1x8x128xf32>,
    %c7_i32 = arith.constant 7 : i32
    %323 = arith.index_cast %c7_i32 : i32 to index
    %c0_108 = arith.constant 0 : index
    %c0_109 = arith.constant 0 : index
    %324 = vector.load %arg1[%323, %c0_108, %c0_109] : memref<8x8x1xf32, #tpu.memory_space<vmem>>, vector<1x8x1xf32>
    %325 = vector.shape_cast %324 : vector<1x8x1xf32> to vector<8x1xf32>
    %326 = vector.broadcast %325 : vector<8x1xf32> to vector<8x512xf32>
    %327 = vector.broadcast %4 : vector<1x512xf32> to vector<8x512xf32>
    %328 = arith.mulf %326, %327 : vector<8x512xf32>
    %329 = vector.broadcast %5 : vector<1x512xf32> to vector<8x512xf32>
    %330 = arith.addf %328, %329 : vector<8x512xf32>
    %cst_110 = arith.constant dense<0.000000e+00> : vector<8x512xf32>
    %331 = tpu.matmul %318, %3, %cst_110 {dimension_numbers = #tpu.dot_dimension_numbers<[1], [0], [0], [1], [0, 0, 1, 1], [], []>} : vector<8x128xf32>, vector<128x512xf32>, vector<8x512xf32> -> vector<8x512xf32>
    %332 = arith.addf %330, %331 : vector<8x512xf32>
    %333 = vector.extract_strided_slice %332 {offsets = [0, 0], sizes = [8, 128], strides = [1, 1]} : vector<8x512xf32> to vector<8x128xf32>
    %cst_111 = arith.constant 5.000000e-01 : f32
    %334 = vector.broadcast %cst_111 : f32 to vector<8x128xf32>
    %335 = arith.mulf %334, %333 : vector<8x128xf32>
    %336 = math.tanh %335 : vector<8x128xf32>
    %cst_112 = arith.constant 5.000000e-01 : f32
    %337 = vector.broadcast %cst_112 : f32 to vector<8x128xf32>
    %338 = arith.mulf %337, %336 : vector<8x128xf32>
    %cst_113 = arith.constant 5.000000e-01 : f32
    %339 = vector.broadcast %cst_113 : f32 to vector<8x128xf32>
    %340 = arith.addf %338, %339 : vector<8x128xf32>
    %341 = vector.extract_strided_slice %332 {offsets = [0, 128], sizes = [8, 128], strides = [1, 1]} : vector<8x512xf32> to vector<8x128xf32>
    %cst_114 = arith.constant 5.000000e-01 : f32
    %342 = vector.broadcast %cst_114 : f32 to vector<8x128xf32>
    %343 = arith.mulf %342, %341 : vector<8x128xf32>
    %344 = math.tanh %343 : vector<8x128xf32>
    %cst_115 = arith.constant 5.000000e-01 : f32
    %345 = vector.broadcast %cst_115 : f32 to vector<8x128xf32>
    %346 = arith.mulf %345, %344 : vector<8x128xf32>
    %cst_116 = arith.constant 5.000000e-01 : f32
    %347 = vector.broadcast %cst_116 : f32 to vector<8x128xf32>
    %348 = arith.addf %346, %347 : vector<8x128xf32>
    %349 = vector.extract_strided_slice %332 {offsets = [0, 256], sizes = [8, 128], strides = [1, 1]} : vector<8x512xf32> to vector<8x128xf32>
    %350 = math.tanh %349 : vector<8x128xf32>
    %351 = vector.extract_strided_slice %332 {offsets = [0, 384], sizes = [8, 128], strides = [1, 1]} : vector<8x512xf32> to vector<8x128xf32>
    %cst_117 = arith.constant 5.000000e-01 : f32
    %352 = vector.broadcast %cst_117 : f32 to vector<8x128xf32>
    %353 = arith.mulf %352, %351 : vector<8x128xf32>
    %354 = math.tanh %353 : vector<8x128xf32>
    %cst_118 = arith.constant 5.000000e-01 : f32
    %355 = vector.broadcast %cst_118 : f32 to vector<8x128xf32>
    %356 = arith.mulf %355, %354 : vector<8x128xf32>
    %cst_119 = arith.constant 5.000000e-01 : f32
    %357 = vector.broadcast %cst_119 : f32 to vector<8x128xf32>
    %358 = arith.addf %356, %357 : vector<8x128xf32>
    %359 = arith.mulf %348, %316 : vector<8x128xf32>
    %360 = arith.mulf %340, %350 : vector<8x128xf32>
    %361 = arith.addf %359, %360 : vector<8x128xf32>
    %362 = math.tanh %361 : vector<8x128xf32>
    %363 = arith.mulf %358, %362 : vector<8x128xf32>
    %364 = arith.index_cast %c7_i32 : i32 to index
    %c0_120 = arith.constant 0 : index
    %c0_121 = arith.constant 0 : index
    %365 = vector.load %arg10[%364, %c0_120, %c0_121] : memref<8x8x128xf32, #tpu.memory_space<vmem>>, vector<1x8x128xf32>
    %366 = vector.shape_cast %365 : vector<1x8x128xf32> to vector<8x128xf32>
    %367 = vector.shape_cast %363 : vector<8x128xf32> to vector<1x8x128xf32>
    tpu.vector_store %arg10[%364, %c0_120, %c0_121], %367 {strides = array<i32>} : memref<8x8x128xf32, #tpu.memory_space<vmem>>, vector<1x8x128xf32>,
    %c8_i32 = arith.constant 8 : i32
    %c0_122 = arith.constant 0 : index
    %c0_123 = arith.constant 0 : index
    %368 = vector.load %arg8[%c0_122, %c0_123] : memref<8x128xf32, #tpu.memory_space<vmem>>, vector<8x128xf32>
    tpu.vector_store %arg8[%c0_122, %c0_123], %363 {strides = array<i32>} : memref<8x128xf32, #tpu.memory_space<vmem>>, vector<8x128xf32>,
    %c0_124 = arith.constant 0 : index
    %c0_125 = arith.constant 0 : index
    %369 = vector.load %arg9[%c0_124, %c0_125] : memref<8x128xf32, #tpu.memory_space<vmem>>, vector<8x128xf32>
    tpu.vector_store %arg9[%c0_124, %c0_125], %361 {strides = array<i32>} : memref<8x128xf32, #tpu.memory_space<vmem>>, vector<8x128xf32>,
    %c0_126 = arith.constant 0 : index
    %c0_127 = arith.constant 0 : index
    %370 = vector.load %arg5[%c0_126, %c0_127] : memref<1x128xf32, #tpu.memory_space<vmem>>, vector<1x128xf32>
    %371 = vector.shape_cast %370 : vector<1x128xf32> to vector<1x1x128xf32>
    %c0_128 = arith.constant 0 : index
    %c0_129 = arith.constant 0 : index
    %c0_130 = arith.constant 0 : index
    %372 = vector.load %arg10[%c0_128, %c0_129, %c0_130] : memref<8x8x128xf32, #tpu.memory_space<vmem>>, vector<8x8x128xf32>
    %373 = vector.broadcast %371 : vector<1x1x128xf32> to vector<8x8x128xf32>
    %374 = arith.mulf %372, %373 : vector<8x8x128xf32>
    %cst_131 = arith.constant dense<0.000000e+00> : vector<8x8xf32>
    %375 = vector.multi_reduction <add>, %374, %cst_131 [2] : vector<8x8x128xf32> to vector<8x8xf32>
    %c0_132 = arith.constant 0 : index
    %c0_133 = arith.constant 0 : index
    %376 = vector.load %arg6[%c0_132, %c0_133] : memref<1x1xf32, #tpu.memory_space<vmem>>, vector<1x1xf32>
    %377 = vector.broadcast %376 : vector<1x1xf32> to vector<8x8xf32>
    %378 = arith.addf %375, %377 : vector<8x8xf32>
    %c0_134 = arith.constant 0 : index
    %c0_135 = arith.constant 0 : index
    %c0_136 = arith.constant 0 : index
    %379 = vector.load %arg7[%c0_134, %c0_135, %c0_136] : memref<1x8x8xf32, #tpu.memory_space<vmem>>, vector<1x8x8xf32>
    %380 = vector.shape_cast %379 : vector<1x8x8xf32> to vector<8x8xf32>
    %381 = vector.shape_cast %378 : vector<8x8xf32> to vector<1x8x8xf32>
    tpu.vector_store %arg7[%c0_134, %c0_135, %c0_136], %381 {strides = array<i32>} : memref<1x8x8xf32, #tpu.memory_space<vmem>>, vector<1x8x8xf32>,
    return
  }
  func.func @transform_0(%arg0: i32) -> (i32, i32, i32) {
    %c0_i32 = arith.constant 0 : i32
    %c0_i32_0 = arith.constant 0 : i32
    %c0_i32_1 = arith.constant 0 : i32
    return %arg0, %c0_i32, %c0_i32_0 : i32, i32, i32
  }
  func.func @transform_1(%arg0: i32) -> (i32, i32) {
    %c0_i32 = arith.constant 0 : i32
    %c0_i32_0 = arith.constant 0 : i32
    %c0_i32_1 = arith.constant 0 : i32
    return %c0_i32, %c0_i32_0 : i32, i32
  }
  func.func @transform_2(%arg0: i32) -> (i32, i32) {
    %c0_i32 = arith.constant 0 : i32
    %c0_i32_0 = arith.constant 0 : i32
    %c0_i32_1 = arith.constant 0 : i32
    return %c0_i32, %c0_i32_0 : i32, i32
  }
  func.func @transform_3(%arg0: i32) -> (i32, i32) {
    %c0_i32 = arith.constant 0 : i32
    %c0_i32_0 = arith.constant 0 : i32
    %c0_i32_1 = arith.constant 0 : i32
    return %c0_i32, %c0_i32_0 : i32, i32
  }
  func.func @transform_4(%arg0: i32) -> (i32, i32) {
    %c0_i32 = arith.constant 0 : i32
    %c0_i32_0 = arith.constant 0 : i32
    %c0_i32_1 = arith.constant 0 : i32
    return %c0_i32, %c0_i32_0 : i32, i32
  }
  func.func @transform_5(%arg0: i32) -> (i32, i32) {
    %c0_i32 = arith.constant 0 : i32
    %c0_i32_0 = arith.constant 0 : i32
    %c0_i32_1 = arith.constant 0 : i32
    return %c0_i32, %c0_i32_0 : i32, i32
  }
  func.func @transform_6(%arg0: i32) -> (i32, i32, i32) {
    %c0_i32 = arith.constant 0 : i32
    %c0_i32_0 = arith.constant 0 : i32
    %c0_i32_1 = arith.constant 0 : i32
    return %arg0, %c0_i32, %c0_i32_0 : i32, i32, i32
  }
}

</mosaic_0001>

<bundles_post_ra>
// kernel: tpu_custom_call.1
= control target key start
LH: loop header
LB: loop body
LE: loop exit
PB: predicated region body
PF: predicated region fallthrough
CT: control target
= control target key end

     0   :  { %s2370_s0 = inlined_call_operand.vmem [shape: f32[8,8,1], index: 0, kind: input, shape index: {}]   ;;  %s2371_s1 = inlined_call_operand.vmem [shape: f32[1,512], index: 1, kind: input, shape index: {}]   ;;  %s2372_s2 = inlined_call_operand.vmem [shape: f32[1,512], index: 2, kind: input, shape index: {}]   ;;  %s2373_s3 = inlined_call_operand.hbm [shape: f32[128,512], index: 3, kind: input, shape index: {}]   ;;  %s2374_s4 = inlined_call_operand.vmem [shape: f32[1,128], index: 4, kind: input, shape index: {}]   ;;  %s2375_s5 = inlined_call_operand.<no memory space> [shape: f32[1,1], index: 5, kind: input, shape index: {}]   ;;  %s2376_s6 = inlined_call_operand.hbm [shape: f32[1,8,8], index: 6, kind: output, shape index: {}]  }
   0x1   :  { %v11_v0 = vstv %s2375_s5 }
   0x2   :  { %12 = vst [vmem:[#allocation5] sm:$0x1] %v11_v0 }
   0x3   :  { %13 = vsyncpa [#allocation7], 0 }
   0x4   :  { %14 = vsyncpa [#allocation8], 0  ;;  %s25_s25 = sshll.u32 %s2373_s3, 4  ;;  %s1404_s26 = smov [#allocation6]   ;;  %s26_s25 = int_to_ptr.hbm [resolvable:$true] %s25_s25 }
   0x5   :  { %s27_s27 = sshll.u32 %s1404_s26, 4  ;;  %s1405_s28 = smov 512   ;;  %s28_s27 = int_to_ptr.vmem [resolvable:$true] %s27_s27 }
   0x6   :  { %s1406_s29 = smov 32  }
   0x7   :  { %33 = dma.hbm_to_vmem [thread:$0]  %s26_s25, 8192, %s28_s27, [#allocation7], %s1405_s28, %s1405_s28, %s1406_s29  }
   0x8   :  { %1400 = dma.done.wait [#allocation7], 8192  }
   0x9   :  { %1401 = vsyncadd [#allocation7], 4294959104  ;;  %v1407_v1 = vmov 0   ;;  %v1451_v2 = vld [vmem:[#allocation6 + $0x1e0] sm:$0xff]  ;;  %v1453_v3 = vld [vmem:[#allocation6 + $0x1e8] sm:$0xff]  ;;  %vm1155_vm0 = vcmask 1041409  }
   0xa   :  { %1202 = vset.pattern.permute.xlu0 %v1407_v1  ;;  %1204 = vset.pattern.permute.xlu2 %v1407_v1  ;;  %v1455_v4 = vld [vmem:[#allocation6 + $0x1f0] sm:$0xff]  ;;  %v1459_v5 = vld [vmem:[#allocation6 + $0x1f8] sm:$0xff]  ;;  %v1461_v6 = vld [vmem:[#allocation6 + $0x1c0] sm:$0xff]  ;;  %vm1157_vm1 = vcmask 1042434   ;;  %vm1159_vm2 = vcmask 1043459   ;;  %vm1161_vm3 = vcmask 1044484  }
   0xb   :  { %1203 = vset.pattern.permute.xlu1 %v1407_v1  ;;  %148 = vmatpush.msra.mxu0 %v1451_v2  ;;  %v1463_v7 = vld [vmem:[#allocation6 + $0x1c8] sm:$0xff]  ;;  %v1467_v8 = vld [vmem:[#allocation6 + $0x1d0] sm:$0xff]  ;;  %v1469_v9 = vld [vmem:[#allocation6 + $0x1d8] sm:$0xff]  ;;  %vm1163_vm4 = vcmask 1045509   ;;  %vm1165_vm5 = vcmask 1046534   ;;  %s1179_s28 = sshll.u32 %s2376_s6, 4  ;;  %s1180_s28 = int_to_ptr.hbm [resolvable:$true] %s1179_s28 }
   0xc   :  { %168 = vmatpush.msra.mxu1 %v1453_v3  ;;  %188 = vmatpush.msra.mxu2 %v1455_v4  ;;  %v1471_v10 = vld [vmem:[#allocation6 + $0x1a0] sm:$0xff]  ;;  %v1475_v11 = vld [vmem:[#allocation6 + $0x1a8] sm:$0xff]  ;;  %v1477_v12 = vld [vmem:[#allocation6 + $0x1b0] sm:$0xff]  ;;  %vm1167_vm6 = vcmask 1047559   ;;  %vm1170_vm7 = vcmask 64512  }
   0xd   :  { %208 = vmatpush.msra.mxu3 %v1459_v5  ;;  %149 = vmatpush.msra.mxu0 %v1461_v6  ;;  %v1479_v13 = vld [vmem:[#allocation6 + $0x1b8] sm:$0xff]  ;;  %v1483_v14 = vld [vmem:[#allocation6 + $0x180] sm:$0xff]  ;;  %v1485_v15 = vld [vmem:[#allocation6 + $0x188] sm:$0xff] }
   0xe   :  { %169 = vmatpush.msra.mxu1 %v1463_v7  ;;  %189 = vmatpush.msra.mxu2 %v1467_v8  ;;  %v1489_v16 = vld [vmem:[#allocation6 + $0x190] sm:$0xff]  ;;  %v1491_v17 = vld [vmem:[#allocation6 + $0x198] sm:$0xff]  ;;  %v1495_v18 = vld [vmem:[#allocation6 + $0x160] sm:$0xff] }
   0xf   :  { %209 = vmatpush.msra.mxu3 %v1469_v9  ;;  %150 = vmatpush.msra.mxu0 %v1471_v10  ;;  %v1497_v19 = vld [vmem:[#allocation6 + $0x168] sm:$0xff]  ;;  %v1501_v20 = vld [vmem:[#allocation6 + $0x170] sm:$0xff]  ;;  %v1503_v21 = vld [vmem:[#allocation6 + $0x178] sm:$0xff] }
  0x10   :  { %170 = vmatpush.msra.mxu1 %v1475_v11  ;;  %190 = vmatpush.msra.mxu2 %v1477_v12  ;;  %v1507_v22 = vld [vmem:[#allocation6 + $0x140] sm:$0xff]  ;;  %v1509_v23 = vld [vmem:[#allocation6 + $0x148] sm:$0xff]  ;;  %v1513_v24 = vld [vmem:[#allocation6 + $0x150] sm:$0xff] }
  0x11   :  { %210 = vmatpush.msra.mxu3 %v1479_v13  ;;  %151 = vmatpush.msra.mxu0 %v1483_v14  ;;  %v1515_v25 = vld [vmem:[#allocation6 + $0x158] sm:$0xff]  ;;  %v1519_v26 = vld [vmem:[#allocation6 + $0x120] sm:$0xff]  ;;  %v1521_v27 = vld [vmem:[#allocation6 + $0x128] sm:$0xff] }
  0x12   :  { %171 = vmatpush.msra.mxu1 %v1485_v15  ;;  %191 = vmatpush.msra.mxu2 %v1489_v16  ;;  %v1525_v28 = vld [vmem:[#allocation6 + $0x130] sm:$0xff]  ;;  %v1527_v29 = vld [vmem:[#allocation6 + $0x138] sm:$0xff]  ;;  %v1531_v30 = vld [vmem:[#allocation6 + $0x100] sm:$0xff] }
  0x13   :  { %211 = vmatpush.msra.mxu3 %v1491_v17  ;;  %152 = vmatpush.msra.mxu0 %v1495_v18  ;;  %v1533_v31 = vld [vmem:[#allocation6 + $0x108] sm:$0xff]  ;;  %v1537_v32 = vld [vmem:[#allocation6 + $0x110] sm:$0xff]  ;;  %v1539_v33 = vld [vmem:[#allocation6 + $0x118] sm:$0xff] }
  0x14   :  { %172 = vmatpush.msra.mxu1 %v1497_v19  ;;  %192 = vmatpush.msra.mxu2 %v1501_v20  ;;  %v1543_v34 = vld [vmem:[#allocation6 + $0xe0] sm:$0xff]  ;;  %v1545_v35 = vld [vmem:[#allocation6 + $0xe8] sm:$0xff]  ;;  %v1549_v36 = vld [vmem:[#allocation6 + $0xf0] sm:$0xff] }
  0x15   :  { %212 = vmatpush.msra.mxu3 %v1503_v21  ;;  %153 = vmatpush.msra.mxu0 %v1507_v22  ;;  %v1551_v37 = vld [vmem:[#allocation6 + $0xf8] sm:$0xff]  ;;  %v1555_v38 = vld [vmem:[#allocation6 + $0xc0] sm:$0xff]  ;;  %v1557_v39 = vld [vmem:[#allocation6 + $0xc8] sm:$0xff] }
  0x16   :  { %173 = vmatpush.msra.mxu1 %v1509_v23  ;;  %193 = vmatpush.msra.mxu2 %v1513_v24  ;;  %v1561_v40 = vld [vmem:[#allocation6 + $0xd0] sm:$0xff]  ;;  %v1563_v41 = vld [vmem:[#allocation6 + $0xd8] sm:$0xff]  ;;  %v1567_v42 = vld [vmem:[#allocation6 + $0xa0] sm:$0xff] }
  0x17   :  { %213 = vmatpush.msra.mxu3 %v1515_v25  ;;  %154 = vmatpush.msra.mxu0 %v1519_v26  ;;  %v1569_v43 = vld [vmem:[#allocation6 + $0xa8] sm:$0xff]  ;;  %v1573_v44 = vld [vmem:[#allocation6 + $0xb0] sm:$0xff]  ;;  %v1575_v45 = vld [vmem:[#allocation6 + $0xb8] sm:$0xff] }
  0x18   :  { %174 = vmatpush.msra.mxu1 %v1521_v27  ;;  %194 = vmatpush.msra.mxu2 %v1525_v28  ;;  %2484 = vst [vmem:[#allocation12_spill] sm:$0xff] %v1569_v43  ;;  %v116_v46 = vld [vmem:[%s2370_s0] sm:$0xff]  ;;  %v1586_v48 = vld [vmem:[#allocation6 + $0x88] sm:$0xff]  ;;  %v1588_v49 = vld [vmem:[#allocation6 + $0x90] sm:$0xff] }
  0x19   :  { %214 = vmatpush.msra.mxu3 %v1527_v29  ;;  %155 = vmatpush.msra.mxu0 %v1531_v30  ;;  %2485 = vst [vmem:[#allocation13_spill] sm:$0xff] %v1573_v44  ;;  %v1582_v47 = vld [vmem:[#allocation6 + $0x80] sm:$0xff]  ;;  %v1592_v50 = vld [vmem:[#allocation6 + $0x98] sm:$0xff]  ;;  %v1597_v52 = vld [vmem:[#allocation6 + $0x68] sm:$0xff] }
  0x1a   :  { %175 = vmatpush.msra.mxu1 %v1533_v31  ;;  %195 = vmatpush.msra.mxu2 %v1537_v32  ;;  %2486 = vst [vmem:[#allocation14_spill] sm:$0xff] %v1575_v45  ;;  %v1594_v51 = vld [vmem:[#allocation6 + $0x60] sm:$0xff]  ;;  %v1599_v53 = vld [vmem:[#allocation6 + $0x70] sm:$0xff]  ;;  %v1603_v54 = vld [vmem:[#allocation6 + $0x78] sm:$0xff] }
  0x1b   :  { %215 = vmatpush.msra.mxu3 %v1539_v33  ;;  %156 = vmatpush.msra.mxu0 %v1543_v34  ;;  %2487 = vst [vmem:[#allocation15_spill] sm:$0xff] %v1582_v47  ;;  %v1605_v55 = vld [vmem:[#allocation6 + $0x40] sm:$0xff]  ;;  %v1609_v56 = vld [vmem:[#allocation6 + $0x48] sm:$0xff]  ;;  %v1611_v57 = vld [vmem:[#allocation6 + $0x50] sm:$0xff] }
  0x1c   :  { %176 = vmatpush.msra.mxu1 %v1545_v35  ;;  %196 = vmatpush.msra.mxu2 %v1549_v36  ;;  %2488 = vst [vmem:[#allocation16_spill] sm:$0xff] %v1586_v48  ;;  %v1615_v58 = vld [vmem:[#allocation6 + $0x58] sm:$0xff]  ;;  %v1617_v59 = vld [vmem:[#allocation6 + $0x20] sm:$0xff]  ;;  %v1621_v60 = vld [vmem:[#allocation6 + $0x28] sm:$0xff] }
  0x1d   :  { %216 = vmatpush.msra.mxu3 %v1551_v37  ;;  %157 = vmatpush.msra.mxu0 %v1555_v38  ;;  %2489 = vst [vmem:[#allocation17_spill] sm:$0xff] %v1588_v49  ;;  %v1623_v61 = vld [vmem:[#allocation6 + $0x30] sm:$0xff]  ;;  %v1627_v62 = vld [vmem:[#allocation6 + $0x38] sm:$0xff]  ;;  %v1189_v63 = vld [vmem:[%s2370_s0 + $0x8] sm:$0xff] }
  0x1e   :  { %177 = vmatpush.msra.mxu1 %v1557_v39  ;;  %197 = vmatpush.msra.mxu2 %v1561_v40  ;;  %2490 = vst [vmem:[#allocation18_spill] sm:$0xff] %v1592_v50  ;;  %v1634_v0 = vld [vmem:[#allocation6] sm:$0xff]  ;;  %v1636_v1 = vld [vmem:[#allocation6 + $0x8] sm:$0xff] }
  0x1f   :  { %217 = vmatpush.msra.mxu3 %v1563_v41  ;;  %158 = vmatpush.msra.mxu0 %v1567_v42  ;;  %2491 = vst [vmem:[#allocation19_spill] sm:$0xff] %v1594_v51 }
  0x20   :  { %178 = vmatpush.msra.mxu1 %v1569_v43  ;;  %198 = vmatpush.msra.mxu2 %v1573_v44  ;;  %2492 = vst [vmem:[#allocation20_spill] sm:$0xff] %v1597_v52 }
  0x21   :  { %218 = vmatpush.msra.mxu3 %v1575_v45  ;;  %119 = vperm.xlu0 %1202, %v116_v46   ;;  %2493 = vst [vmem:[#allocation21_spill] sm:$0xff] %v1599_v53  ;;  %v1640_v46 = vld [vmem:[#allocation6 + $0x10] sm:$0xff] }
  0x22   :  { %159 = vmatpush.msra.mxu0 %v1582_v47  ;;  %179 = vmatpush.msra.mxu1 %v1586_v48  ;;  %2494 = vst [vmem:[#allocation22_spill] sm:$0xff] %v1603_v54 }
  0x23   :  { %199 = vmatpush.msra.mxu2 %v1588_v49  ;;  %2495 = vst [vmem:[#allocation23_spill] sm:$0xff] %v1605_v55  ;;  %219 = vmatpush.msra.mxu3 %v1592_v50 }
  0x24   :  { %160 = vmatpush.msra.mxu0 %v1594_v51  ;;  %2496 = vst [vmem:[#allocation24_spill] sm:$0xff] %v1609_v56  ;;  %180 = vmatpush.msra.mxu1 %v1597_v52 }
  0x25   :  { %2497 = vst [vmem:[#allocation25_spill] sm:$0xff] %v1611_v57  ;;  %200 = vmatpush.msra.mxu2 %v1599_v53  ;;  %220 = vmatpush.msra.mxu3 %v1603_v54 }
  0x26   :  { %2498 = vst [vmem:[#allocation26_spill] sm:$0xff] %v1615_v58  ;;  %161 = vmatpush.msra.mxu0 %v1605_v55  ;;  %181 = vmatpush.msra.mxu1 %v1609_v56 }
  0x27   :  { %2499 = vst [vmem:[#allocation27_spill] sm:$0xff] %v1617_v59  ;;  %201 = vmatpush.msra.mxu2 %v1611_v57  ;;  %221 = vmatpush.msra.mxu3 %v1615_v58  ;;  %v1642_v57 = vld [vmem:[#allocation6 + $0x18] sm:$0xff] }
  0x28   :  { %2500 = vst [vmem:[#allocation28_spill] sm:$0xff] %v1621_v60  ;;  %162 = vmatpush.msra.mxu0 %v1617_v59  ;;  %182 = vmatpush.msra.mxu1 %v1621_v60  ;;  %v1192_v60 = vld [vmem:[%s2370_s0 + $0x20] sm:$0xff] }
  0x29   :  { %2501 = vst [vmem:[#allocation29_spill] sm:$0xff] %v1623_v61  ;;  %202 = vmatpush.msra.mxu2 %v1623_v61  ;;  %222 = vmatpush.msra.mxu3 %v1627_v62  ;;  %v1408_v61 = vmov 0.0  }
  0x2a   :  { %2502 = vst [vmem:[#allocation30_spill] sm:$0xff] %v1627_v62  ;;  %255 = vperm.xlu0 %1202, %v1189_v63   ;;  %163 = vmatpush.msra.mxu0 %v1634_v0  ;;  %v1194_v63 = vld [vmem:[%s2370_s0 + $0x30] sm:$0xff] }
  0x2b   :  { %2503 = vst [vmem:[#allocation31_spill] sm:$0xff] %v1634_v0  ;;  %183 = vmatpush.msra.mxu1 %v1636_v1  ;;  %203 = vmatpush.msra.mxu2 %v1640_v46 }
  0x2c   :  { %2504 = vst [vmem:[#allocation32_spill] sm:$0xff] %v1636_v1  ;;  %223 = vmatpush.msra.mxu3 %v1642_v57  ;;  %164 = vmatmul.f32.vlgmr.msra.gmra.mxu0 %v1408_v61 }
  0x2d   :  { %2505 = vst [vmem:[#allocation33_spill] sm:$0xff] %v1640_v46  ;;  %184 = vmatmul.f32.vlgmr.msra.gmra.mxu1 %v1408_v61  ;;  %204 = vmatmul.f32.vlgmr.msra.gmra.mxu2 %v1408_v61 }
  0x2e   :  { %2506 = vst [vmem:[#allocation34_spill] sm:$0xff] %v1642_v57  ;;  %224 = vmatmul.f32.vlgmr.msra.gmra.mxu3 %v1408_v61  ;;  %612 = vperm.xlu2 %1204, %v1192_v60   ;;  %v2507_v60 = vld [vmem:[#allocation25_spill] sm:$0xff] }
  0x2f   :  { %266 = vmatpush.msrb.mxu0 %v1451_v2  ;;  %286 = vmatpush.msrb.mxu1 %v1453_v3  ;;  %v2508_v61 = vld [vmem:[#allocation28_spill] sm:$0xff] }
  0x30   :  { %306 = vmatpush.msrb.mxu2 %v1455_v4  ;;  %326 = vmatpush.msrb.mxu3 %v1459_v5 }
  0x31   :  { %267 = vmatpush.msrb.mxu0 %v1461_v6  ;;  %287 = vmatpush.msrb.mxu1 %v1463_v7 }
  0x32   :  { %850 = vperm.xlu0 %1202, %v1194_v63   ;;  %307 = vmatpush.msrb.mxu2 %v1467_v8  ;;  %v2509_v63 = vld [vmem:[#allocation29_spill] sm:$0xff] }
  0x33   :  { %327 = vmatpush.msrb.mxu3 %v1469_v9  ;;  %268 = vmatpush.msrb.mxu0 %v1471_v10 }
  0x34   :  { %288 = vmatpush.msrb.mxu1 %v1475_v11  ;;  %308 = vmatpush.msrb.mxu2 %v1477_v12 }
  0x35   :  { %328 = vmatpush.msrb.mxu3 %v1479_v13  ;;  %269 = vmatpush.msrb.mxu0 %v1483_v14 }
  0x36   :  { %289 = vmatpush.msrb.mxu1 %v1485_v15  ;;  %309 = vmatpush.msrb.mxu2 %v1489_v16 }
  0x37   :  { %329 = vmatpush.msrb.mxu3 %v1491_v17  ;;  %270 = vmatpush.msrb.mxu0 %v1495_v18 }
  0x38   :  { %290 = vmatpush.msrb.mxu1 %v1497_v19  ;;  %310 = vmatpush.msrb.mxu2 %v1501_v20 }
  0x39   :  { %330 = vmatpush.msrb.mxu3 %v1503_v21  ;;  %271 = vmatpush.msrb.mxu0 %v1507_v22 }
  0x3a   :  { %291 = vmatpush.msrb.mxu1 %v1509_v23  ;;  %311 = vmatpush.msrb.mxu2 %v1513_v24 }
  0x3b   :  { %331 = vmatpush.msrb.mxu3 %v1515_v25  ;;  %272 = vmatpush.msrb.mxu0 %v1519_v26 }
  0x3c   :  { %292 = vmatpush.msrb.mxu1 %v1521_v27  ;;  %312 = vmatpush.msrb.mxu2 %v1525_v28 }
  0x3d   :  { %332 = vmatpush.msrb.mxu3 %v1527_v29  ;;  %273 = vmatpush.msrb.mxu0 %v1531_v30 }
  0x3e   :  { %293 = vmatpush.msrb.mxu1 %v1533_v31  ;;  %313 = vmatpush.msrb.mxu2 %v1537_v32 }
  0x3f   :  { %333 = vmatpush.msrb.mxu3 %v1539_v33  ;;  %274 = vmatpush.msrb.mxu0 %v1543_v34 }
  0x40   :  { %294 = vmatpush.msrb.mxu1 %v1545_v35  ;;  %314 = vmatpush.msrb.mxu2 %v1549_v36 }
  0x41   :  { %334 = vmatpush.msrb.mxu3 %v1551_v37  ;;  %275 = vmatpush.msrb.mxu0 %v1555_v38 }
  0x42   :  { %295 = vmatpush.msrb.mxu1 %v1557_v39  ;;  %315 = vmatpush.msrb.mxu2 %v1561_v40 }
  0x43   :  { %335 = vmatpush.msrb.mxu3 %v1563_v41  ;;  %276 = vmatpush.msrb.mxu0 %v1567_v42 }
  0x44   :  { %296 = vmatpush.msrb.mxu1 %v1569_v43  ;;  %316 = vmatpush.msrb.mxu2 %v1573_v44 }
  0x45   :  { %336 = vmatpush.msrb.mxu3 %v1575_v45  ;;  %277 = vmatpush.msrb.mxu0 %v1582_v47 }
  0x46   :  { %297 = vmatpush.msrb.mxu1 %v1586_v48  ;;  %317 = vmatpush.msrb.mxu2 %v1588_v49 }
  0x47   :  { %337 = vmatpush.msrb.mxu3 %v1592_v50  ;;  %278 = vmatpush.msrb.mxu0 %v1594_v51 }
  0x48   :  { %298 = vmatpush.msrb.mxu1 %v1597_v52  ;;  %318 = vmatpush.msrb.mxu2 %v1599_v53 }
  0x49   :  { %338 = vmatpush.msrb.mxu3 %v1603_v54  ;;  %279 = vmatpush.msrb.mxu0 %v1605_v55 }
  0x4a   :  { %299 = vmatpush.msrb.mxu1 %v1609_v56  ;;  %319 = vmatpush.msrb.mxu2 %v2507_v60 }
  0x4b   :  { %339 = vmatpush.msrb.mxu3 %v1615_v58  ;;  %280 = vmatpush.msrb.mxu0 %v1617_v59 }
  0x4c   :  { %300 = vmatpush.msrb.mxu1 %v2508_v61  ;;  %320 = vmatpush.msrb.mxu2 %v2509_v63 }
  0x4d   :  { %340 = vmatpush.msrb.mxu3 %v1627_v62  ;;  %281 = vmatpush.msrb.mxu0 %v1634_v0 }
  0x4e   :  { %301 = vmatpush.msrb.mxu1 %v1636_v1  ;;  %321 = vmatpush.msrb.mxu2 %v1640_v46 }
  0x4f   :  { %341 = vmatpush.msrb.mxu3 %v1642_v57  ;;  %385 = vmatpush.msra.mxu0 %v1451_v2 }
  0x50   :  { %405 = vmatpush.msra.mxu1 %v1453_v3  ;;  %425 = vmatpush.msra.mxu2 %v1455_v4 }
  0x51   :  { %445 = vmatpush.msra.mxu3 %v1459_v5  ;;  %386 = vmatpush.msra.mxu0 %v1461_v6 }
  0x52   :  { %406 = vmatpush.msra.mxu1 %v1463_v7  ;;  %426 = vmatpush.msra.mxu2 %v1467_v8 }
  0x53   :  { %446 = vmatpush.msra.mxu3 %v1469_v9  ;;  %387 = vmatpush.msra.mxu0 %v1471_v10 }
  0x54   :  { %407 = vmatpush.msra.mxu1 %v1475_v11  ;;  %427 = vmatpush.msra.mxu2 %v1477_v12 }
  0x55   :  { %447 = vmatpush.msra.mxu3 %v1479_v13  ;;  %388 = vmatpush.msra.mxu0 %v1483_v14 }
  0x56   :  { %408 = vmatpush.msra.mxu1 %v1485_v15  ;;  %428 = vmatpush.msra.mxu2 %v1489_v16 }
  0x57   :  { %448 = vmatpush.msra.mxu3 %v1491_v17  ;;  %389 = vmatpush.msra.mxu0 %v1495_v18 }
  0x58   :  { %409 = vmatpush.msra.mxu1 %v1497_v19  ;;  %429 = vmatpush.msra.mxu2 %v1501_v20 }
  0x59   :  { %449 = vmatpush.msra.mxu3 %v1503_v21  ;;  %390 = vmatpush.msra.mxu0 %v1507_v22 }
  0x5a   :  { %410 = vmatpush.msra.mxu1 %v1509_v23  ;;  %430 = vmatpush.msra.mxu2 %v1513_v24 }
  0x5b   :  { %450 = vmatpush.msra.mxu3 %v1515_v25  ;;  %391 = vmatpush.msra.mxu0 %v1519_v26 }
  0x5c   :  { %411 = vmatpush.msra.mxu1 %v1521_v27  ;;  %431 = vmatpush.msra.mxu2 %v1525_v28 }
  0x5d   :  { %451 = vmatpush.msra.mxu3 %v1527_v29  ;;  %392 = vmatpush.msra.mxu0 %v1531_v30 }
  0x5e   :  { %412 = vmatpush.msra.mxu1 %v1533_v31  ;;  %432 = vmatpush.msra.mxu2 %v1537_v32 }
  0x5f   :  { %452 = vmatpush.msra.mxu3 %v1539_v33  ;;  %393 = vmatpush.msra.mxu0 %v1543_v34 }
  0x60   :  { %413 = vmatpush.msra.mxu1 %v1545_v35  ;;  %433 = vmatpush.msra.mxu2 %v1549_v36 }
  0x61   :  { %453 = vmatpush.msra.mxu3 %v1551_v37  ;;  %394 = vmatpush.msra.mxu0 %v1555_v38 }
  0x62   :  { %414 = vmatpush.msra.mxu1 %v1557_v39  ;;  %434 = vmatpush.msra.mxu2 %v1561_v40 }
  0x63   :  { %454 = vmatpush.msra.mxu3 %v1563_v41  ;;  %395 = vmatpush.msra.mxu0 %v1567_v42 }
  0x64   :  { %415 = vmatpush.msra.mxu1 %v1569_v43  ;;  %435 = vmatpush.msra.mxu2 %v1573_v44 }
  0x65   :  { %455 = vmatpush.msra.mxu3 %v1575_v45  ;;  %396 = vmatpush.msra.mxu0 %v1582_v47 }
  0x66   :  { %416 = vmatpush.msra.mxu1 %v1586_v48  ;;  %436 = vmatpush.msra.mxu2 %v1588_v49 }
  0x67   :  { %456 = vmatpush.msra.mxu3 %v1592_v50  ;;  %397 = vmatpush.msra.mxu0 %v1594_v51 }
  0x68   :  { %417 = vmatpush.msra.mxu1 %v1597_v52  ;;  %437 = vmatpush.msra.mxu2 %v1599_v53 }
  0x69   :  { %457 = vmatpush.msra.mxu3 %v1603_v54  ;;  %398 = vmatpush.msra.mxu0 %v1605_v55 }
  0x6a   :  { %418 = vmatpush.msra.mxu1 %v1609_v56  ;;  %438 = vmatpush.msra.mxu2 %v2507_v60 }
  0x6b   :  { %458 = vmatpush.msra.mxu3 %v1615_v58  ;;  %399 = vmatpush.msra.mxu0 %v1617_v59  ;;  %v1193_v58 = vld [vmem:[%s2370_s0 + $0x28] sm:$0xff]  ;;  %v1205_v59 = vld [vmem:[#allocation5] ss:$0 sm:$0xff] }
  0x6c   :  { %419 = vmatpush.msra.mxu1 %v2508_v61  ;;  %439 = vmatpush.msra.mxu2 %v2509_v63  ;;  %v112_v63 = vld [vmem:[%s2371_s1] sm:$0xf] }
  0x6d   :  { %459 = vmatpush.msra.mxu3 %v1627_v62  ;;  %400 = vmatpush.msra.mxu0 %v1634_v0  ;;  %v1789_v62 = vperm.slane %v112_v63, 0  ;;  %v1791_v0 = vperm.slane %v112_v63, 1  ;;  %v1804_v55 = vperm.slane %v112_v63, 2  ;;  %v1806_v54 = vperm.slane %v112_v63, 3 }
  0x6e   :  { %420 = vmatpush.msra.mxu1 %v1636_v1  ;;  %440 = vmatpush.msra.mxu2 %v1640_v46  ;;  %v113_v46 = vld [vmem:[%s2372_s2] sm:$0xf] }
  0x6f   :  { %460 = vmatpush.msra.mxu3 %v1642_v57  ;;  %731 = vperm.xlu2 %1204, %v1193_v58   ;;  %2510 = vst [vmem:[#allocation35_spill] sm:$0xff] %v1789_v62  ;;  %v1797_v61 = vperm.slane %v113_v46, 0  ;;  %v1809_v49 = vperm.slane %v113_v46, 2  ;;  %v1812_v48 = vperm.slane %v113_v46, 3 }
  0x70   :  { %2511 = vst [vmem:[#allocation36_spill] sm:$0xff] %v1791_v0 }
  0x71   :  { %2512 = vst [vmem:[#allocation37_spill] sm:$0xff] %v1797_v61 }
  0x72   :  { %2514 = vst [vmem:[#allocation39_spill] sm:$0xff] %v1804_v55 }
  0x73   :  { %2515 = vst [vmem:[#allocation40_spill] sm:$0xff] %v1806_v54 }
  0x74   :  { %2516 = vst [vmem:[#allocation41_spill] sm:$0xff] %v1809_v49 }
  0x77   :  { %1126 = vperm.xlu2 %1204, %v1205_v59   ;;  %v1800_v59 = vperm.slane %v113_v46, 1 }
  0x79   :  { %2513 = vst [vmem:[#allocation38_spill] sm:$0xff] %v1800_v59 }
  0x93   :  { %v120_v57 = vpop.permute.xlu0 %119 }
  0x94   :  { %v131_v1 = vmul.f32 %v1789_v62, %v120_v57  ;;  %v132_v58 = vmul.f32 %v1791_v0, %v120_v57  ;;  %v133_v62 = vmul.f32 %v1804_v55, %v120_v57  ;;  %v134_v0 = vmul.f32 %v1806_v54, %v120_v57 }
  0x96   :  { %v144_v60 = vadd.f32 %v1797_v61, %v131_v1  ;;  %v145_v56 = vadd.f32 %v1800_v59, %v132_v58  ;;  %v146_v58 = vadd.f32 %v1809_v49, %v133_v62  ;;  %v147_v63 = vadd.f32 %v1812_v48, %v134_v0 }
  0xa9   :  { %v165_v53 = vpop.f32.mrf.mxu0 }
  0xaa   :  { %v185_v52 = vpop.f32.mrf.mxu1  ;;  %v228_v51 = vadd.f32 %v165_v53, %v144_v60 }
  0xab   :  { %v229_v50 = vadd.f32 %v185_v52, %v145_v56 }
  0xac   :  { %v232_v47 = vmul.f32 0.5, %v228_v51 }
  0xad   :  { %v236_v1 = vmul.f32 0.5, %v229_v50 }
  0xae   :  { %1207 = vtanh.f32 %v232_v47 }
  0xaf   :  { %1209 = vtanh.f32 %v236_v1 }
  0xb0   :  { %v205_v59 = vpop.f32.mrf.mxu2 }
  0xb1   :  { %v225_v61 = vpop.f32.mrf.mxu3  ;;  %v230_v53 = vadd.f32 %v205_v59, %v146_v58 }
  0xb2   :  { %v231_v52 = vadd.f32 %v225_v61, %v147_v63  ;;  %v1822_v61 = vld [vmem:[%s2374_s4] ss:$0 sm:$0xff]  ;;  %v2518_v63 = vld [vmem:[#allocation15_spill] sm:$0xff] }
  0xb3   :  { %1211 = vtanh.f32 %v230_v53  ;;  %v2519_v53 = vld [vmem:[#allocation16_spill] sm:$0xff] }
  0xb4   :  { %v241_v56 = vmul.f32 0.5, %v231_v52  ;;  %v1208_v60 = vpop.eup %1207  ;;  %v2520_v52 = vld [vmem:[#allocation17_spill] sm:$0xff] }
  0xb5   :  { %v1210_v55 = vpop.eup %1209  ;;  %v234_v45 = vmul.f32 0.5, %v1208_v60  ;;  %v2522_v60 = vld [vmem:[#allocation19_spill] sm:$0xff] }
  0xb6   :  { %v238_v57 = vmul.f32 0.5, %v1210_v55  ;;  %1213 = vtanh.f32 %v241_v56  ;;  %v2521_v56 = vld [vmem:[#allocation18_spill] sm:$0xff] }
  0xb7   :  { %v235_v46 = vadd.f32 0.5, %v234_v45 }
  0xb8   :  { %v239_v51 = vadd.f32 0.5, %v238_v57  ;;  %v2523_v57 = vld [vmem:[#allocation20_spill] sm:$0xff] }
  0xb9   :  { %v1212_v50 = vpop.eup %1211 }
  0xba   :  { %v245_v47 = vmul.f32 0.0, %v239_v51  ;;  %v246_v1 = vmul.f32 %v1212_v50, %v235_v46  ;;  %v2524_v46 = vld [vmem:[#allocation21_spill] sm:$0xff]  ;;  %v2525_v51 = vld [vmem:[#allocation22_spill] sm:$0xff]  ;;  %v2526_v50 = vld [vmem:[#allocation23_spill] sm:$0xff] }
  0xbc   :  { %v1214_v54 = vpop.eup %1213  ;;  %v1816_v62 = vadd.f32 %v246_v1, %v245_v47  ;;  %v2527_v47 = vld [vmem:[#allocation24_spill] sm:$0xff]  ;;  %v2528_v1 = vld [vmem:[#allocation25_spill] sm:$0xff] }
  0xbd   :  { %v243_v0 = vmul.f32 0.5, %v1214_v54  ;;  %v2517_v54 = vld [vmem:[#allocation14_spill] sm:$0xff] }
  0xbe   :  { %1215 = vtanh.f32 %v1816_v62 }
  0xbf   :  { %v244_v59 = vadd.f32 0.5, %v243_v0  ;;  %v2529_v0 = vld [vmem:[#allocation26_spill] sm:$0xff] }
  0xc4   :  { %v1216_v58 = vpop.eup %1215 }
  0xc5   :  { %v249_v55 = vmul.f32 %v1216_v58, %v244_v59  ;;  %v2530_v59 = vld [vmem:[#allocation27_spill] sm:$0xff]  ;;  %v2531_v58 = vld [vmem:[#allocation28_spill] sm:$0xff] }
  0xc7   :  { %282 = vmatmul.f32.vlgmr.msrb.gmra.mxu0 %v249_v55  ;;  %302 = vmatmul.f32.vlgmr.msrb.gmra.mxu1 %v249_v55  ;;  %v1098_v45 = vmul.f32 %v1822_v61, %v249_v55 }
  0xc8   :  { %322 = vmatmul.f32.vlgmr.msrb.gmra.mxu2 %v249_v55  ;;  %342 = vmatmul.f32.vlgmr.msrb.gmra.mxu3 %v249_v55  ;;  %v2532_v55 = vld [vmem:[#allocation29_spill] sm:$0xff] }
  0xc9   :  { %1106 = vadd.xlane.f32.xlu2 %v1098_v45  ;;  %504 = vmatpush.msrb.mxu0 %v1451_v2  ;;  %v2533_v45 = vld [vmem:[#allocation30_spill] sm:$0xff] }
  0xca   :  { %524 = vmatpush.msrb.mxu1 %v1453_v3  ;;  %544 = vmatpush.msrb.mxu2 %v1455_v4 }
  0xcb   :  { %564 = vmatpush.msrb.mxu3 %v1459_v5  ;;  %505 = vmatpush.msrb.mxu0 %v1461_v6 }
  0xcc   :  { %525 = vmatpush.msrb.mxu1 %v1463_v7  ;;  %545 = vmatpush.msrb.mxu2 %v1467_v8 }
  0xcd   :  { %565 = vmatpush.msrb.mxu3 %v1469_v9  ;;  %506 = vmatpush.msrb.mxu0 %v1471_v10 }
  0xce   :  { %526 = vmatpush.msrb.mxu1 %v1475_v11  ;;  %546 = vmatpush.msrb.mxu2 %v1477_v12 }
  0xcf   :  { %566 = vmatpush.msrb.mxu3 %v1479_v13  ;;  %507 = vmatpush.msrb.mxu0 %v1483_v14 }
  0xd0   :  { %527 = vmatpush.msrb.mxu1 %v1485_v15  ;;  %547 = vmatpush.msrb.mxu2 %v1489_v16 }
  0xd1   :  { %567 = vmatpush.msrb.mxu3 %v1491_v17  ;;  %508 = vmatpush.msrb.mxu0 %v1495_v18 }
  0xd2   :  { %528 = vmatpush.msrb.mxu1 %v1497_v19  ;;  %548 = vmatpush.msrb.mxu2 %v1501_v20 }
  0xd3   :  { %568 = vmatpush.msrb.mxu3 %v1503_v21  ;;  %509 = vmatpush.msrb.mxu0 %v1507_v22 }
  0xd4   :  { %529 = vmatpush.msrb.mxu1 %v1509_v23  ;;  %549 = vmatpush.msrb.mxu2 %v1513_v24 }
  0xd5   :  { %569 = vmatpush.msrb.mxu3 %v1515_v25  ;;  %510 = vmatpush.msrb.mxu0 %v1519_v26 }
  0xd6   :  { %530 = vmatpush.msrb.mxu1 %v1521_v27  ;;  %550 = vmatpush.msrb.mxu2 %v1525_v28 }
  0xd7   :  { %570 = vmatpush.msrb.mxu3 %v1527_v29  ;;  %511 = vmatpush.msrb.mxu0 %v1531_v30 }
  0xd8   :  { %531 = vmatpush.msrb.mxu1 %v1533_v31  ;;  %551 = vmatpush.msrb.mxu2 %v1537_v32 }
  0xd9   :  { %571 = vmatpush.msrb.mxu3 %v1539_v33  ;;  %512 = vmatpush.msrb.mxu0 %v1543_v34 }
  0xda   :  { %532 = vmatpush.msrb.mxu1 %v1545_v35  ;;  %552 = vmatpush.msrb.mxu2 %v1549_v36 }
  0xdb   :  { %572 = vmatpush.msrb.mxu3 %v1551_v37  ;;  %513 = vmatpush.msrb.mxu0 %v1555_v38 }
  0xdc   :  { %533 = vmatpush.msrb.mxu1 %v1557_v39  ;;  %553 = vmatpush.msrb.mxu2 %v1561_v40 }
  0xdd   :  { %573 = vmatpush.msrb.mxu3 %v1563_v41  ;;  %514 = vmatpush.msrb.mxu0 %v1567_v42 }
  0xde   :  { %534 = vmatpush.msrb.mxu1 %v1569_v43  ;;  %554 = vmatpush.msrb.mxu2 %v1573_v44 }
  0xdf   :  { %574 = vmatpush.msrb.mxu3 %v2517_v54  ;;  %515 = vmatpush.msrb.mxu0 %v2518_v63  ;;  %v2542_v63 = vld [vmem:[#allocation39_spill] sm:$0xff]  ;;  %v2543_v54 = vld [vmem:[#allocation40_spill] sm:$0xff] }
  0xe0   :  { %535 = vmatpush.msrb.mxu1 %v2519_v53  ;;  %555 = vmatpush.msrb.mxu2 %v2520_v52 }
  0xe1   :  { %575 = vmatpush.msrb.mxu3 %v2521_v56  ;;  %516 = vmatpush.msrb.mxu0 %v2522_v60 }
  0xe2   :  { %536 = vmatpush.msrb.mxu1 %v2523_v57  ;;  %556 = vmatpush.msrb.mxu2 %v2524_v46  ;;  %v2534_v57 = vld [vmem:[#allocation31_spill] sm:$0xff]  ;;  %v2535_v46 = vld [vmem:[#allocation32_spill] sm:$0xff] }
  0xe3   :  { %576 = vmatpush.msrb.mxu3 %v2525_v51  ;;  %517 = vmatpush.msrb.mxu0 %v2526_v50  ;;  %v2536_v51 = vld [vmem:[#allocation33_spill] sm:$0xff]  ;;  %v2537_v50 = vld [vmem:[#allocation34_spill] sm:$0xff] }
  0xe4   :  { %537 = vmatpush.msrb.mxu1 %v2527_v47  ;;  %557 = vmatpush.msrb.mxu2 %v2528_v1  ;;  %v2538_v1 = vld [vmem:[#allocation35_spill] sm:$0xff]  ;;  %v2539_v47 = vld [vmem:[#allocation36_spill] sm:$0xff] }
  0xe5   :  { %577 = vmatpush.msrb.mxu3 %v2529_v0  ;;  %518 = vmatpush.msrb.mxu0 %v2530_v59  ;;  %v1190_v0 = vld [vmem:[%s2370_s0 + $0x10] sm:$0xff]  ;;  %v256_v59 = vpop.permute.xlu0 %255 }
  0xe6   :  { %538 = vmatpush.msrb.mxu1 %v2531_v58  ;;  %558 = vmatpush.msrb.mxu2 %v2532_v55  ;;  %v258_v58 = vmul.f32 %v256_v59, %v2538_v1  ;;  %v259_v55 = vmul.f32 %v256_v59, %v2539_v47  ;;  %v261_v44 = vmul.f32 %v256_v59, %v2543_v54  ;;  %v1195_v47 = vld [vmem:[%s2370_s0 + $0x38] sm:$0xff] }
  0xe7   :  { %578 = vmatpush.msrb.mxu3 %v2533_v45  ;;  %519 = vmatpush.msrb.mxu0 %v2534_v57  ;;  %v1191_v57 = vld [vmem:[%s2370_s0 + $0x18] sm:$0xff] }
  0xe8   :  { %539 = vmatpush.msrb.mxu1 %v2535_v46  ;;  %559 = vmatpush.msrb.mxu2 %v2536_v51  ;;  %v2540_v46 = vld [vmem:[#allocation37_spill] sm:$0xff]  ;;  %v2541_v51 = vld [vmem:[#allocation38_spill] sm:$0xff] }
  0xe9   :  { %579 = vmatpush.msrb.mxu3 %v2537_v50  ;;  %374 = vperm.xlu1 %1203, %v1190_v0   ;;  %v262_v45 = vadd.f32 %v258_v58, %v2540_v46  ;;  %v263_v60 = vadd.f32 %v259_v55, %v2541_v51  ;;  %v260_v0 = vmul.f32 %v256_v59, %v2542_v63 }
  0xea   :  { %v265_v58 = vadd.f32 %v261_v44, %v1812_v48 }
  0xf1   :  { %493 = vperm.xlu1 %1203, %v1191_v57   ;;  %v264_v57 = vadd.f32 %v260_v0, %v1809_v49 }
  0xf9   :  { %969 = vperm.xlu1 %1203, %v1195_v47  }
 0x144   :  { %v283_v50 = vpop.f32.mrf.mxu0  ;;  %v303_v56 = vpop.f32.mrf.mxu1 }
 0x145   :  { %v346_v52 = vadd.f32 %v283_v50, %v262_v45  ;;  %v347_v53 = vadd.f32 %v303_v56, %v263_v60 }
 0x147   :  { %v350_v1 = vmul.f32 0.5, %v346_v52  ;;  %v354_v43 = vmul.f32 0.5, %v347_v53 }
 0x149   :  { %1217 = vtanh.f32 %v350_v1 }
 0x14a   :  { %1219 = vtanh.f32 %v354_v43 }
 0x14b   :  { %v323_v55 = vpop.f32.mrf.mxu2  ;;  %v343_v50 = vpop.f32.mrf.mxu3 }
 0x14c   :  { %v348_v56 = vadd.f32 %v323_v55, %v264_v57  ;;  %v349_v60 = vadd.f32 %v343_v50, %v265_v58 }
 0x14e   :  { %1221 = vtanh.f32 %v348_v56  ;;  %v359_v45 = vmul.f32 0.5, %v349_v60 }
 0x14f   :  { %v1218_v59 = vpop.eup %1217 }
 0x150   :  { %v1220_v54 = vpop.eup %1219  ;;  %v352_v63 = vmul.f32 0.5, %v1218_v59  ;;  %1223 = vtanh.f32 %v359_v45 }
 0x151   :  { %v356_v51 = vmul.f32 0.5, %v1220_v54 }
 0x152   :  { %v353_v52 = vadd.f32 0.5, %v352_v63 }
 0x153   :  { %v357_v53 = vadd.f32 0.5, %v356_v51 }
 0x154   :  { %v1222_v1 = vpop.eup %1221 }
 0x155   :  { %v363_v43 = vmul.f32 %v357_v53, %v1816_v62  ;;  %v364_v47 = vmul.f32 %v1222_v1, %v353_v52  ;;  %v2572_v62 = vld [vmem:[#allocation41_spill] sm:$0xff] }
 0x156   :  { %v1224_v0 = vpop.eup %1223 }
 0x157   :  { %v1907_v49 = vadd.f32 %v364_v47, %v363_v43  ;;  %v361_v44 = vmul.f32 0.5, %v1224_v0 }
 0x159   :  { %1225 = vtanh.f32 %v1907_v49  ;;  %v362_v57 = vadd.f32 0.5, %v361_v44 }
 0x15f   :  { %v1226_v58 = vpop.eup %1225 }
 0x160   :  { %v367_v55 = vmul.f32 %v1226_v58, %v362_v57 }
 0x162   :  { %401 = vmatmul.f32.vlgmr.msra.gmra.mxu0 %v367_v55  ;;  %421 = vmatmul.f32.vlgmr.msra.gmra.mxu1 %v367_v55  ;;  %v1099_v54 = vmul.f32 %v1822_v61, %v367_v55 }
 0x163   :  { %441 = vmatmul.f32.vlgmr.msra.gmra.mxu2 %v367_v55  ;;  %461 = vmatmul.f32.vlgmr.msra.gmra.mxu3 %v367_v55 }
 0x164   :  { %1108 = vadd.xlane.f32.xlu0 %v1099_v54  ;;  %623 = vmatpush.msra.mxu0 %v1451_v2  ;;  %v2544_v2 = vld [vmem:[#allocation12_spill] sm:$0xff] }
 0x165   :  { %643 = vmatpush.msra.mxu1 %v1453_v3  ;;  %663 = vmatpush.msra.mxu2 %v1455_v4  ;;  %v2545_v3 = vld [vmem:[#allocation13_spill] sm:$0xff]  ;;  %v2546_v4 = vld [vmem:[#allocation14_spill] sm:$0xff] }
 0x166   :  { %683 = vmatpush.msra.mxu3 %v1459_v5  ;;  %624 = vmatpush.msra.mxu0 %v1461_v6  ;;  %v2547_v5 = vld [vmem:[#allocation15_spill] sm:$0xff]  ;;  %v2548_v6 = vld [vmem:[#allocation16_spill] sm:$0xff] }
 0x167   :  { %644 = vmatpush.msra.mxu1 %v1463_v7  ;;  %664 = vmatpush.msra.mxu2 %v1467_v8  ;;  %v2549_v7 = vld [vmem:[#allocation17_spill] sm:$0xff]  ;;  %v2550_v8 = vld [vmem:[#allocation18_spill] sm:$0xff] }
 0x168   :  { %684 = vmatpush.msra.mxu3 %v1469_v9  ;;  %625 = vmatpush.msra.mxu0 %v1471_v10  ;;  %v2551_v9 = vld [vmem:[#allocation19_spill] sm:$0xff]  ;;  %v2552_v10 = vld [vmem:[#allocation20_spill] sm:$0xff] }
 0x169   :  { %645 = vmatpush.msra.mxu1 %v1475_v11  ;;  %665 = vmatpush.msra.mxu2 %v1477_v12  ;;  %v2553_v11 = vld [vmem:[#allocation21_spill] sm:$0xff]  ;;  %v2554_v12 = vld [vmem:[#allocation22_spill] sm:$0xff] }
 0x16a   :  { %685 = vmatpush.msra.mxu3 %v1479_v13  ;;  %626 = vmatpush.msra.mxu0 %v1483_v14  ;;  %v2555_v13 = vld [vmem:[#allocation23_spill] sm:$0xff]  ;;  %v2556_v14 = vld [vmem:[#allocation24_spill] sm:$0xff] }
 0x16b   :  { %646 = vmatpush.msra.mxu1 %v1485_v15  ;;  %666 = vmatpush.msra.mxu2 %v1489_v16  ;;  %v2557_v15 = vld [vmem:[#allocation25_spill] sm:$0xff]  ;;  %v2558_v16 = vld [vmem:[#allocation26_spill] sm:$0xff] }
 0x16c   :  { %686 = vmatpush.msra.mxu3 %v1491_v17  ;;  %627 = vmatpush.msra.mxu0 %v1495_v18  ;;  %v2559_v17 = vld [vmem:[#allocation27_spill] sm:$0xff]  ;;  %v2560_v18 = vld [vmem:[#allocation28_spill] sm:$0xff] }
 0x16d   :  { %647 = vmatpush.msra.mxu1 %v1497_v19  ;;  %667 = vmatpush.msra.mxu2 %v1501_v20  ;;  %v2561_v19 = vld [vmem:[#allocation29_spill] sm:$0xff]  ;;  %v2562_v20 = vld [vmem:[#allocation30_spill] sm:$0xff] }
 0x16e   :  { %687 = vmatpush.msra.mxu3 %v1503_v21  ;;  %628 = vmatpush.msra.mxu0 %v1507_v22  ;;  %v2563_v21 = vld [vmem:[#allocation31_spill] sm:$0xff]  ;;  %v2564_v22 = vld [vmem:[#allocation32_spill] sm:$0xff] }
 0x16f   :  { %648 = vmatpush.msra.mxu1 %v1509_v23  ;;  %668 = vmatpush.msra.mxu2 %v1513_v24  ;;  %v2565_v23 = vld [vmem:[#allocation33_spill] sm:$0xff]  ;;  %v2566_v24 = vld [vmem:[#allocation34_spill] sm:$0xff] }
 0x170   :  { %688 = vmatpush.msra.mxu3 %v1515_v25  ;;  %629 = vmatpush.msra.mxu0 %v1519_v26  ;;  %v375_v25 = vpop.permute.xlu1 %374  ;;  %v2567_v26 = vld [vmem:[#allocation35_spill] sm:$0xff] }
 0x171   :  { %649 = vmatpush.msra.mxu1 %v1521_v27  ;;  %669 = vmatpush.msra.mxu2 %v1525_v28  ;;  %v377_v27 = vmul.f32 %v375_v25, %v2567_v26  ;;  %v2568_v28 = vld [vmem:[#allocation36_spill] sm:$0xff] }
 0x172   :  { %689 = vmatpush.msra.mxu3 %v1527_v29  ;;  %630 = vmatpush.msra.mxu0 %v1531_v30  ;;  %v378_v29 = vmul.f32 %v375_v25, %v2568_v28 }
 0x173   :  { %650 = vmatpush.msra.mxu1 %v1533_v31  ;;  %670 = vmatpush.msra.mxu2 %v1537_v32  ;;  %v381_v30 = vadd.f32 %v377_v27, %v2540_v46  ;;  %v2569_v31 = vld [vmem:[#allocation38_spill] sm:$0xff]  ;;  %v2003_v27 = vld [vmem:[#allocation6 + $0x1c8] sm:$0xff] }
 0x174   :  { %690 = vmatpush.msra.mxu3 %v1539_v33  ;;  %631 = vmatpush.msra.mxu0 %v1543_v34  ;;  %v382_v32 = vadd.f32 %v378_v29, %v2569_v31  ;;  %v2006_v29 = vld [vmem:[#allocation6 + $0x1d0] sm:$0xff] }
 0x175   :  { %651 = vmatpush.msra.mxu1 %v1545_v35  ;;  %671 = vmatpush.msra.mxu2 %v1549_v36 }
 0x176   :  { %691 = vmatpush.msra.mxu3 %v1551_v37  ;;  %632 = vmatpush.msra.mxu0 %v1555_v38  ;;  %v2570_v37 = vld [vmem:[#allocation39_spill] sm:$0xff] }
 0x177   :  { %652 = vmatpush.msra.mxu1 %v1557_v39  ;;  %672 = vmatpush.msra.mxu2 %v1561_v40  ;;  %v379_v38 = vmul.f32 %v375_v25, %v2570_v37  ;;  %v2571_v39 = vld [vmem:[#allocation40_spill] sm:$0xff] }
 0x178   :  { %692 = vmatpush.msra.mxu3 %v1563_v41  ;;  %633 = vmatpush.msra.mxu0 %v1567_v42  ;;  %v380_v40 = vmul.f32 %v375_v25, %v2571_v39  ;;  %v2000_v25 = vld [vmem:[#allocation6 + $0x1c0] sm:$0xff] }
 0x179   :  { %653 = vmatpush.msra.mxu1 %v2544_v2  ;;  %673 = vmatpush.msra.mxu2 %v2545_v3  ;;  %v383_v63 = vadd.f32 %v379_v38, %v2572_v62  ;;  %v2027_v38 = vld [vmem:[#allocation6 + $0x188] sm:$0xff] }
 0x17a   :  { %693 = vmatpush.msra.mxu3 %v2546_v4  ;;  %634 = vmatpush.msra.mxu0 %v2547_v5  ;;  %v384_v51 = vadd.f32 %v380_v40, %v1812_v48  ;;  %v2030_v40 = vld [vmem:[#allocation6 + $0x190] sm:$0xff] }
 0x17b   :  { %654 = vmatpush.msra.mxu1 %v2548_v6  ;;  %674 = vmatpush.msra.mxu2 %v2549_v7  ;;  %v1988_v7 = vld [vmem:[#allocation6 + $0x1e0] sm:$0xff] }
 0x17c   :  { %694 = vmatpush.msra.mxu3 %v2550_v8  ;;  %635 = vmatpush.msra.mxu0 %v2551_v9  ;;  %v1994_v8 = vld [vmem:[#allocation6 + $0x1f0] sm:$0xff]  ;;  %v1997_v9 = vld [vmem:[#allocation6 + $0x1f8] sm:$0xff] }
 0x17d   :  { %655 = vmatpush.msra.mxu1 %v2552_v10  ;;  %675 = vmatpush.msra.mxu2 %v2553_v11 }
 0x17e   :  { %695 = vmatpush.msra.mxu3 %v2554_v12  ;;  %636 = vmatpush.msra.mxu0 %v2555_v13 }
 0x17f   :  { %656 = vmatpush.msra.mxu1 %v2556_v14  ;;  %676 = vmatpush.msra.mxu2 %v2557_v15 }
 0x180   :  { %696 = vmatpush.msra.mxu3 %v2558_v16  ;;  %637 = vmatpush.msra.mxu0 %v2559_v17 }
 0x181   :  { %657 = vmatpush.msra.mxu1 %v2560_v18  ;;  %677 = vmatpush.msra.mxu2 %v2561_v19 }
 0x182   :  { %697 = vmatpush.msra.mxu3 %v2562_v20  ;;  %638 = vmatpush.msra.mxu0 %v2563_v21 }
 0x183   :  { %658 = vmatpush.msra.mxu1 %v2564_v22  ;;  %678 = vmatpush.msra.mxu2 %v2565_v23 }
 0x184   :  { %698 = vmatpush.msra.mxu3 %v2566_v24 }
 0x1df   :  { %v402_v33 = vpop.f32.mrf.mxu0  ;;  %v422_v34 = vpop.f32.mrf.mxu1 }
 0x1e0   :  { %v465_v35 = vadd.f32 %v402_v33, %v381_v30  ;;  %v466_v36 = vadd.f32 %v422_v34, %v382_v32  ;;  %v2009_v30 = vld [vmem:[#allocation6 + $0x1d8] sm:$0xff]  ;;  %v2012_v32 = vld [vmem:[#allocation6 + $0x1a0] sm:$0xff]  ;;  %v2015_v33 = vld [vmem:[#allocation6 + $0x1a8] sm:$0xff] }
 0x1e1   :  { %v2018_v34 = vld [vmem:[#allocation6 + $0x1b0] sm:$0xff] }
 0x1e2   :  { %v469_v41 = vmul.f32 0.5, %v465_v35  ;;  %v473_v42 = vmul.f32 0.5, %v466_v36  ;;  %v2021_v35 = vld [vmem:[#allocation6 + $0x1b8] sm:$0xff]  ;;  %v2024_v36 = vld [vmem:[#allocation6 + $0x180] sm:$0xff] }
 0x1e4   :  { %1227 = vtanh.f32 %v469_v41  ;;  %v2033_v41 = vld [vmem:[#allocation6 + $0x198] sm:$0xff] }
 0x1e5   :  { %1229 = vtanh.f32 %v473_v42  ;;  %v2036_v42 = vld [vmem:[#allocation6 + $0x160] sm:$0xff] }
 0x1e6   :  { %v442_v50 = vpop.f32.mrf.mxu2  ;;  %v462_v56 = vpop.f32.mrf.mxu3 }
 0x1e7   :  { %v467_v60 = vadd.f32 %v442_v50, %v383_v63  ;;  %v468_v45 = vadd.f32 %v462_v56, %v384_v51  ;;  %v2039_v63 = vld [vmem:[#allocation6 + $0x168] sm:$0xff]  ;;  %v2042_v51 = vld [vmem:[#allocation6 + $0x170] sm:$0xff]  ;;  %v2045_v50 = vld [vmem:[#allocation6 + $0x178] sm:$0xff] }
 0x1e8   :  { %v2048_v56 = vld [vmem:[#allocation6 + $0x140] sm:$0xff] }
 0x1e9   :  { %1231 = vtanh.f32 %v467_v60  ;;  %v478_v59 = vmul.f32 0.5, %v468_v45  ;;  %v2051_v60 = vld [vmem:[#allocation6 + $0x148] sm:$0xff]  ;;  %v2054_v45 = vld [vmem:[#allocation6 + $0x150] sm:$0xff] }
 0x1ea   :  { %v1228_v52 = vpop.eup %1227 }
 0x1eb   :  { %v1230_v53 = vpop.eup %1229  ;;  %v471_v1 = vmul.f32 0.5, %v1228_v52  ;;  %1233 = vtanh.f32 %v478_v59  ;;  %v2057_v59 = vld [vmem:[#allocation6 + $0x158] sm:$0xff]  ;;  %v2060_v52 = vld [vmem:[#allocation6 + $0x120] sm:$0xff] }
 0x1ec   :  { %v475_v43 = vmul.f32 0.5, %v1230_v53  ;;  %v2063_v53 = vld [vmem:[#allocation6 + $0x128] sm:$0xff] }
 0x1ed   :  { %v472_v47 = vadd.f32 0.5, %v471_v1  ;;  %v2066_v1 = vld [vmem:[#allocation6 + $0x130] sm:$0xff] }
 0x1ee   :  { %v476_v0 = vadd.f32 0.5, %v475_v43  ;;  %v2069_v43 = vld [vmem:[#allocation6 + $0x138] sm:$0xff] }
 0x1ef   :  { %v1232_v44 = vpop.eup %1231 }
 0x1f0   :  { %v482_v57 = vmul.f32 %v476_v0, %v1907_v49  ;;  %v483_v58 = vmul.f32 %v1232_v44, %v472_v47  ;;  %v1991_v49 = vld [vmem:[#allocation6 + $0x1e8] sm:$0xff]  ;;  %v2072_v47 = vld [vmem:[#allocation6 + $0x100] sm:$0xff]  ;;  %v2078_v44 = vld [vmem:[#allocation6 + $0x110] sm:$0xff] }
 0x1f1   :  { %v1234_v55 = vpop.eup %1233  ;;  %v2075_v0 = vld [vmem:[#allocation6 + $0x108] sm:$0xff] }
 0x1f2   :  { %v1984_v54 = vadd.f32 %v483_v58, %v482_v57  ;;  %v480_v2 = vmul.f32 0.5, %v1234_v55  ;;  %v2081_v57 = vld [vmem:[#allocation6 + $0x118] sm:$0xff]  ;;  %v2084_v58 = vld [vmem:[#allocation6 + $0xe0] sm:$0xff]  ;;  %v2087_v55 = vld [vmem:[#allocation6 + $0xe8] sm:$0xff] }
 0x1f3   :  { %2573 = vst [vmem:[#allocation12_spill] sm:$0xff] %v2087_v55 }
 0x1f4   :  { %1235 = vtanh.f32 %v1984_v54  ;;  %v481_v3 = vadd.f32 0.5, %v480_v2  ;;  %v2090_v2 = vld [vmem:[#allocation6 + $0xf0] sm:$0xff] }
 0x1f5   :  { %2574 = vst [vmem:[#allocation13_spill] sm:$0xff] %v2090_v2 }
 0x1fa   :  { %v1236_v4 = vpop.eup %1235 }
 0x1fb   :  { %v486_v5 = vmul.f32 %v1236_v4, %v481_v3  ;;  %v2093_v3 = vld [vmem:[#allocation6 + $0xf8] sm:$0xff]  ;;  %v2096_v4 = vld [vmem:[#allocation6 + $0xc0] sm:$0xff] }
 0x1fc   :  { %2575 = vst [vmem:[#allocation14_spill] sm:$0xff] %v2093_v3 }
 0x1fd   :  { %520 = vmatmul.f32.vlgmr.msrb.gmra.mxu0 %v486_v5  ;;  %540 = vmatmul.f32.vlgmr.msrb.gmra.mxu1 %v486_v5  ;;  %v1100_v6 = vmul.f32 %v1822_v61, %v486_v5  ;;  %2576 = vst [vmem:[#allocation15_spill] sm:$0xff] %v2096_v4 }
 0x1fe   :  { %560 = vmatmul.f32.vlgmr.msrb.gmra.mxu2 %v486_v5  ;;  %580 = vmatmul.f32.vlgmr.msrb.gmra.mxu3 %v486_v5  ;;  %v2099_v5 = vld [vmem:[#allocation6 + $0xc8] sm:$0xff] }
 0x1ff   :  { %1110 = vadd.xlane.f32.xlu1 %v1100_v6  ;;  %742 = vmatpush.msrb.mxu0 %v1988_v7  ;;  %2577 = vst [vmem:[#allocation16_spill] sm:$0xff] %v2099_v5  ;;  %v2102_v6 = vld [vmem:[#allocation6 + $0xd0] sm:$0xff] }
 0x200   :  { %762 = vmatpush.msrb.mxu1 %v1991_v49  ;;  %782 = vmatpush.msrb.mxu2 %v1994_v8  ;;  %2578 = vst [vmem:[#allocation17_spill] sm:$0xff] %v2102_v6 }
 0x201   :  { %802 = vmatpush.msrb.mxu3 %v1997_v9  ;;  %743 = vmatpush.msrb.mxu0 %v2000_v25 }
 0x202   :  { %763 = vmatpush.msrb.mxu1 %v2003_v27  ;;  %783 = vmatpush.msrb.mxu2 %v2006_v29 }
 0x203   :  { %803 = vmatpush.msrb.mxu3 %v2009_v30  ;;  %744 = vmatpush.msrb.mxu0 %v2012_v32 }
 0x204   :  { %764 = vmatpush.msrb.mxu1 %v2015_v33  ;;  %784 = vmatpush.msrb.mxu2 %v2018_v34 }
 0x205   :  { %804 = vmatpush.msrb.mxu3 %v2021_v35  ;;  %745 = vmatpush.msrb.mxu0 %v2024_v36 }
 0x206   :  { %765 = vmatpush.msrb.mxu1 %v2027_v38  ;;  %785 = vmatpush.msrb.mxu2 %v2030_v40 }
 0x207   :  { %805 = vmatpush.msrb.mxu3 %v2033_v41  ;;  %746 = vmatpush.msrb.mxu0 %v2036_v42 }
 0x208   :  { %766 = vmatpush.msrb.mxu1 %v2039_v63  ;;  %786 = vmatpush.msrb.mxu2 %v2042_v51 }
 0x209   :  { %806 = vmatpush.msrb.mxu3 %v2045_v50  ;;  %747 = vmatpush.msrb.mxu0 %v2048_v56 }
 0x20a   :  { %767 = vmatpush.msrb.mxu1 %v2051_v60  ;;  %787 = vmatpush.msrb.mxu2 %v2054_v45 }
 0x20b   :  { %807 = vmatpush.msrb.mxu3 %v2057_v59  ;;  %748 = vmatpush.msrb.mxu0 %v2060_v52 }
 0x20c   :  { %768 = vmatpush.msrb.mxu1 %v2063_v53  ;;  %788 = vmatpush.msrb.mxu2 %v2066_v1 }
 0x20d   :  { %808 = vmatpush.msrb.mxu3 %v2069_v43  ;;  %749 = vmatpush.msrb.mxu0 %v2072_v47 }
 0x20e   :  { %769 = vmatpush.msrb.mxu1 %v2075_v0  ;;  %789 = vmatpush.msrb.mxu2 %v2078_v44 }
 0x20f   :  { %809 = vmatpush.msrb.mxu3 %v2081_v57  ;;  %750 = vmatpush.msrb.mxu0 %v2084_v58 }
 0x210   :  { %770 = vmatpush.msrb.mxu1 %v2087_v55  ;;  %790 = vmatpush.msrb.mxu2 %v2090_v2  ;;  %v2105_v55 = vld [vmem:[#allocation6 + $0xd8] sm:$0xff]  ;;  %v2108_v2 = vld [vmem:[#allocation6 + $0xa0] sm:$0xff] }
 0x211   :  { %810 = vmatpush.msrb.mxu3 %v2093_v3  ;;  %751 = vmatpush.msrb.mxu0 %v2096_v4  ;;  %2579 = vst [vmem:[#allocation18_spill] sm:$0xff] %v2105_v55  ;;  %v2111_v3 = vld [vmem:[#allocation6 + $0xa8] sm:$0xff]  ;;  %v2114_v4 = vld [vmem:[#allocation6 + $0xb0] sm:$0xff] }
 0x212   :  { %771 = vmatpush.msrb.mxu1 %v2099_v5  ;;  %791 = vmatpush.msrb.mxu2 %v2102_v6  ;;  %2580 = vst [vmem:[#allocation19_spill] sm:$0xff] %v2108_v2  ;;  %v2117_v5 = vld [vmem:[#allocation6 + $0xb8] sm:$0xff]  ;;  %v2120_v6 = vld [vmem:[#allocation6 + $0x80] sm:$0xff] }
 0x213   :  { %811 = vmatpush.msrb.mxu3 %v2105_v55  ;;  %752 = vmatpush.msrb.mxu0 %v2108_v2  ;;  %2581 = vst [vmem:[#allocation20_spill] sm:$0xff] %v2111_v3  ;;  %v2123_v55 = vld [vmem:[#allocation6 + $0x88] sm:$0xff]  ;;  %v2126_v2 = vld [vmem:[#allocation6 + $0x90] sm:$0xff] }
 0x214   :  { %772 = vmatpush.msrb.mxu1 %v2111_v3  ;;  %2582 = vst [vmem:[#allocation21_spill] sm:$0xff] %v2114_v4  ;;  %792 = vmatpush.msrb.mxu2 %v2114_v4  ;;  %v2129_v3 = vld [vmem:[#allocation6 + $0x98] sm:$0xff]  ;;  %v2132_v4 = vld [vmem:[#allocation6 + $0x60] sm:$0xff] }
 0x215   :  { %2583 = vst [vmem:[#allocation22_spill] sm:$0xff] %v2117_v5  ;;  %812 = vmatpush.msrb.mxu3 %v2117_v5  ;;  %753 = vmatpush.msrb.mxu0 %v2120_v6 }
 0x216   :  { %2584 = vst [vmem:[#allocation23_spill] sm:$0xff] %v2120_v6  ;;  %773 = vmatpush.msrb.mxu1 %v2123_v55  ;;  %793 = vmatpush.msrb.mxu2 %v2126_v2 }
 0x217   :  { %2585 = vst [vmem:[#allocation24_spill] sm:$0xff] %v2123_v55  ;;  %813 = vmatpush.msrb.mxu3 %v2129_v3  ;;  %754 = vmatpush.msrb.mxu0 %v2132_v4 }
 0x218   :  { %2586 = vst [vmem:[#allocation25_spill] sm:$0xff] %v2126_v2  ;;  %774 = vmatpush.msrb.mxu1 %v2552_v10  ;;  %794 = vmatpush.msrb.mxu2 %v2553_v11  ;;  %v494_v10 = vpop.permute.xlu1 %493 }
 0x219   :  { %2587 = vst [vmem:[#allocation26_spill] sm:$0xff] %v2129_v3  ;;  %814 = vmatpush.msrb.mxu3 %v2554_v12  ;;  %755 = vmatpush.msrb.mxu0 %v2555_v13  ;;  %v496_v11 = vmul.f32 %v494_v10, %v2567_v26  ;;  %v497_v12 = vmul.f32 %v494_v10, %v2568_v28 }
 0x21a   :  { %2588 = vst [vmem:[#allocation27_spill] sm:$0xff] %v2132_v4  ;;  %775 = vmatpush.msrb.mxu1 %v2556_v14  ;;  %795 = vmatpush.msrb.mxu2 %v2557_v15 }
 0x21b   :  { %815 = vmatpush.msrb.mxu3 %v2558_v16  ;;  %756 = vmatpush.msrb.mxu0 %v2559_v17  ;;  %v500_v13 = vadd.f32 %v496_v11, %v2540_v46  ;;  %v501_v14 = vadd.f32 %v497_v12, %v2569_v31 }
 0x21c   :  { %776 = vmatpush.msrb.mxu1 %v2560_v18  ;;  %796 = vmatpush.msrb.mxu2 %v2561_v19  ;;  %v498_v19 = vmul.f32 %v494_v10, %v2570_v37 }
 0x21d   :  { %816 = vmatpush.msrb.mxu3 %v2562_v20  ;;  %757 = vmatpush.msrb.mxu0 %v2563_v21  ;;  %v499_v20 = vmul.f32 %v494_v10, %v2571_v39 }
 0x21e   :  { %777 = vmatpush.msrb.mxu1 %v2564_v22  ;;  %797 = vmatpush.msrb.mxu2 %v2565_v23  ;;  %v502_v23 = vadd.f32 %v498_v19, %v2572_v62 }
 0x21f   :  { %817 = vmatpush.msrb.mxu3 %v2566_v24  ;;  %v503_v24 = vadd.f32 %v499_v20, %v1812_v48 }
 0x27a   :  { %v521_v15 = vpop.f32.mrf.mxu0  ;;  %v541_v16 = vpop.f32.mrf.mxu1 }
 0x27b   :  { %v584_v17 = vadd.f32 %v521_v15, %v500_v13  ;;  %v585_v18 = vadd.f32 %v541_v16, %v501_v14 }
 0x27d   :  { %v588_v21 = vmul.f32 0.5, %v584_v17  ;;  %v592_v22 = vmul.f32 0.5, %v585_v18 }
 0x27f   :  { %1237 = vtanh.f32 %v588_v21 }
 0x280   :  { %1239 = vtanh.f32 %v592_v22 }
 0x281   :  { %v561_v28 = vpop.f32.mrf.mxu2  ;;  %v581_v11 = vpop.f32.mrf.mxu3 }
 0x282   :  { %v586_v46 = vadd.f32 %v561_v28, %v502_v23  ;;  %v587_v12 = vadd.f32 %v581_v11, %v503_v24  ;;  %v2591_v11 = vld [vmem:[#allocation14_spill] sm:$0xff] }
 0x284   :  { %1241 = vtanh.f32 %v586_v46  ;;  %v597_v31 = vmul.f32 0.5, %v587_v12  ;;  %v2592_v12 = vld [vmem:[#allocation15_spill] sm:$0xff] }
 0x285   :  { %v1238_v13 = vpop.eup %1237 }
 0x286   :  { %v1240_v14 = vpop.eup %1239  ;;  %v590_v15 = vmul.f32 0.5, %v1238_v13  ;;  %1243 = vtanh.f32 %v597_v31  ;;  %v2589_v31 = vld [vmem:[#allocation12_spill] sm:$0xff] }
 0x287   :  { %v594_v16 = vmul.f32 0.5, %v1240_v14  ;;  %v2593_v13 = vld [vmem:[#allocation16_spill] sm:$0xff]  ;;  %v2594_v14 = vld [vmem:[#allocation17_spill] sm:$0xff] }
 0x288   :  { %v591_v10 = vadd.f32 0.5, %v590_v15  ;;  %v2595_v15 = vld [vmem:[#allocation18_spill] sm:$0xff] }
 0x289   :  { %v595_v17 = vadd.f32 0.5, %v594_v16  ;;  %v2596_v16 = vld [vmem:[#allocation19_spill] sm:$0xff] }
 0x28a   :  { %v1242_v18 = vpop.eup %1241 }
 0x28b   :  { %v601_v21 = vmul.f32 %v595_v17, %v1984_v54  ;;  %v602_v22 = vmul.f32 %v1242_v18, %v591_v10  ;;  %v2590_v54 = vld [vmem:[#allocation13_spill] sm:$0xff]  ;;  %v2597_v10 = vld [vmem:[#allocation20_spill] sm:$0xff] }
 0x28c   :  { %v1244_v19 = vpop.eup %1243  ;;  %v2598_v17 = vld [vmem:[#allocation21_spill] sm:$0xff]  ;;  %v2212_v18 = vld [vmem:[#allocation6 + $0x68] sm:$0xff] }
 0x28d   :  { %v2159_v62 = vadd.f32 %v602_v22, %v601_v21  ;;  %v599_v28 = vmul.f32 0.5, %v1244_v19  ;;  %2599 = vst [vmem:[#allocation28_spill] sm:$0xff] %v2212_v18  ;;  %v2215_v21 = vld [vmem:[#allocation6 + $0x70] sm:$0xff]  ;;  %v2218_v22 = vld [vmem:[#allocation6 + $0x78] sm:$0xff]  ;;  %v2221_v19 = vld [vmem:[#allocation6 + $0x40] sm:$0xff] }
 0x28e   :  { %2600 = vst [vmem:[#allocation29_spill] sm:$0xff] %v2215_v21 }
 0x28f   :  { %1245 = vtanh.f32 %v2159_v62  ;;  %v600_v20 = vadd.f32 0.5, %v599_v28  ;;  %2601 = vst [vmem:[#allocation30_spill] sm:$0xff] %v2218_v22  ;;  %v2224_v28 = vld [vmem:[#allocation6 + $0x48] sm:$0xff] }
 0x290   :  { %2602 = vst [vmem:[#allocation31_spill] sm:$0xff] %v2221_v19 }
 0x291   :  { %2603 = vst [vmem:[#allocation32_spill] sm:$0xff] %v2224_v28 }
 0x295   :  { %v1246_v46 = vpop.eup %1245 }
 0x296   :  { %v605_v23 = vmul.f32 %v1246_v46, %v600_v20  ;;  %v2227_v20 = vld [vmem:[#allocation6 + $0x50] sm:$0xff]  ;;  %v2230_v46 = vld [vmem:[#allocation6 + $0x58] sm:$0xff] }
 0x297   :  { %2604 = vst [vmem:[#allocation33_spill] sm:$0xff] %v2227_v20 }
 0x298   :  { %639 = vmatmul.f32.vlgmr.msra.gmra.mxu0 %v605_v23  ;;  %659 = vmatmul.f32.vlgmr.msra.gmra.mxu1 %v605_v23  ;;  %v1101_v24 = vmul.f32 %v1822_v61, %v605_v23  ;;  %2605 = vst [vmem:[#allocation34_spill] sm:$0xff] %v2230_v46 }
 0x299   :  { %679 = vmatmul.f32.vlgmr.msra.gmra.mxu2 %v605_v23  ;;  %699 = vmatmul.f32.vlgmr.msra.gmra.mxu3 %v605_v23  ;;  %v2233_v23 = vld [vmem:[#allocation6 + $0x20] sm:$0xff] }
 0x29a   :  { %1112 = vadd.xlane.f32.xlu0 %v1101_v24  ;;  %861 = vmatpush.msra.mxu0 %v1988_v7  ;;  %2606 = vst [vmem:[#allocation39_spill] sm:$0xff] %v2233_v23  ;;  %v2236_v24 = vld [vmem:[#allocation6 + $0x28] sm:$0xff] }
 0x29b   :  { %881 = vmatpush.msra.mxu1 %v1991_v49  ;;  %901 = vmatpush.msra.mxu2 %v1994_v8  ;;  %2607 = vst [vmem:[#allocation40_spill] sm:$0xff] %v2236_v24 }
 0x29c   :  { %921 = vmatpush.msra.mxu3 %v1997_v9  ;;  %862 = vmatpush.msra.mxu0 %v2000_v25 }
 0x29d   :  { %882 = vmatpush.msra.mxu1 %v2003_v27  ;;  %902 = vmatpush.msra.mxu2 %v2006_v29 }
 0x29e   :  { %922 = vmatpush.msra.mxu3 %v2009_v30  ;;  %863 = vmatpush.msra.mxu0 %v2012_v32 }
 0x29f   :  { %883 = vmatpush.msra.mxu1 %v2015_v33  ;;  %903 = vmatpush.msra.mxu2 %v2018_v34 }
 0x2a0   :  { %923 = vmatpush.msra.mxu3 %v2021_v35  ;;  %864 = vmatpush.msra.mxu0 %v2024_v36 }
 0x2a1   :  { %884 = vmatpush.msra.mxu1 %v2027_v38  ;;  %904 = vmatpush.msra.mxu2 %v2030_v40 }
 0x2a2   :  { %924 = vmatpush.msra.mxu3 %v2033_v41  ;;  %865 = vmatpush.msra.mxu0 %v2036_v42 }
 0x2a3   :  { %885 = vmatpush.msra.mxu1 %v2039_v63  ;;  %905 = vmatpush.msra.mxu2 %v2042_v51 }
 0x2a4   :  { %925 = vmatpush.msra.mxu3 %v2045_v50  ;;  %866 = vmatpush.msra.mxu0 %v2048_v56 }
 0x2a5   :  { %886 = vmatpush.msra.mxu1 %v2051_v60  ;;  %906 = vmatpush.msra.mxu2 %v2054_v45 }
 0x2a6   :  { %926 = vmatpush.msra.mxu3 %v2057_v59  ;;  %867 = vmatpush.msra.mxu0 %v2060_v52 }
 0x2a7   :  { %887 = vmatpush.msra.mxu1 %v2063_v53  ;;  %907 = vmatpush.msra.mxu2 %v2066_v1 }
 0x2a8   :  { %927 = vmatpush.msra.mxu3 %v2069_v43  ;;  %868 = vmatpush.msra.mxu0 %v2072_v47 }
 0x2a9   :  { %888 = vmatpush.msra.mxu1 %v2075_v0  ;;  %908 = vmatpush.msra.mxu2 %v2078_v44 }
 0x2aa   :  { %928 = vmatpush.msra.mxu3 %v2081_v57  ;;  %869 = vmatpush.msra.mxu0 %v2084_v58 }
 0x2ab   :  { %889 = vmatpush.msra.mxu1 %v2589_v31  ;;  %909 = vmatpush.msra.mxu2 %v2590_v54 }
 0x2ac   :  { %929 = vmatpush.msra.mxu3 %v2591_v11  ;;  %870 = vmatpush.msra.mxu0 %v2592_v12 }
 0x2ad   :  { %890 = vmatpush.msra.mxu1 %v2593_v13  ;;  %910 = vmatpush.msra.mxu2 %v2594_v14 }
 0x2ae   :  { %930 = vmatpush.msra.mxu3 %v2595_v15  ;;  %871 = vmatpush.msra.mxu0 %v2596_v16 }
 0x2af   :  { %891 = vmatpush.msra.mxu1 %v2597_v10  ;;  %911 = vmatpush.msra.mxu2 %v2598_v17 }
 0x2b0   :  { %931 = vmatpush.msra.mxu3 %v2117_v5  ;;  %872 = vmatpush.msra.mxu0 %v2120_v6 }
 0x2b1   :  { %892 = vmatpush.msra.mxu1 %v2123_v55  ;;  %912 = vmatpush.msra.mxu2 %v2126_v2 }
 0x2b2   :  { %932 = vmatpush.msra.mxu3 %v2129_v3  ;;  %873 = vmatpush.msra.mxu0 %v2132_v4 }
 0x2b3   :  { %893 = vmatpush.msra.mxu1 %v2212_v18  ;;  %913 = vmatpush.msra.mxu2 %v2215_v21  ;;  %v2615_v18 = vld [vmem:[#allocation37_spill] sm:$0xff] }
 0x2b4   :  { %933 = vmatpush.msra.mxu3 %v2218_v22  ;;  %874 = vmatpush.msra.mxu0 %v2221_v19  ;;  %v2239_v19 = vld [vmem:[#allocation6 + $0x30] sm:$0xff] }
 0x2b5   :  { %894 = vmatpush.msra.mxu1 %v2224_v28  ;;  %914 = vmatpush.msra.mxu2 %v2227_v20  ;;  %2608 = vst [vmem:[#allocation12_spill] sm:$0xff] %v2239_v19  ;;  %v2242_v28 = vld [vmem:[#allocation6 + $0x38] sm:$0xff]  ;;  %v2245_v20 = vld [vmem:[#allocation6] sm:$0xff] }
 0x2b6   :  { %934 = vmatpush.msra.mxu3 %v2230_v46  ;;  %875 = vmatpush.msra.mxu0 %v2233_v23  ;;  %2609 = vst [vmem:[#allocation13_spill] sm:$0xff] %v2242_v28  ;;  %v2248_v46 = vld [vmem:[#allocation6 + $0x8] sm:$0xff]  ;;  %v2251_v23 = vld [vmem:[#allocation6 + $0x10] sm:$0xff] }
 0x2b7   :  { %895 = vmatpush.msra.mxu1 %v2236_v24  ;;  %915 = vmatpush.msra.mxu2 %v2239_v19  ;;  %2610 = vst [vmem:[#allocation14_spill] sm:$0xff] %v2245_v20  ;;  %v2254_v24 = vld [vmem:[#allocation6 + $0x18] sm:$0xff]  ;;  %v613_v19 = vpop.permute.xlu2 %612 }
 0x2b8   :  { %935 = vmatpush.msra.mxu3 %v2242_v28  ;;  %876 = vmatpush.msra.mxu0 %v2245_v20  ;;  %2611 = vst [vmem:[#allocation15_spill] sm:$0xff] %v2248_v46  ;;  %v615_v22 = vmul.f32 %v613_v19, %v2567_v26  ;;  %v2614_v28 = vld [vmem:[#allocation36_spill] sm:$0xff]  ;;  %v2616_v20 = vld [vmem:[#allocation38_spill] sm:$0xff]  ;;  %v617_v5 = vmul.f32 %v613_v19, %v2570_v37 }
 0x2b9   :  { %896 = vmatpush.msra.mxu1 %v2248_v46  ;;  %2612 = vst [vmem:[#allocation16_spill] sm:$0xff] %v2251_v23  ;;  %916 = vmatpush.msra.mxu2 %v2251_v23  ;;  %v616_v21 = vmul.f32 %v613_v19, %v2614_v28  ;;  %v618_v23 = vmul.f32 %v613_v19, %v2571_v39 }
 0x2ba   :  { %2613 = vst [vmem:[#allocation17_spill] sm:$0xff] %v2254_v24  ;;  %936 = vmatpush.msra.mxu3 %v2254_v24  ;;  %v619_v4 = vadd.f32 %v615_v22, %v2615_v18  ;;  %v2617_v24 = vld [vmem:[#allocation41_spill] sm:$0xff] }
 0x2bb   :  { %v620_v3 = vadd.f32 %v616_v21, %v2616_v20  ;;  %v621_v26 = vadd.f32 %v617_v5, %v2617_v24  ;;  %v622_v28 = vadd.f32 %v618_v23, %v1812_v48 }
 0x315   :  { %v640_v2 = vpop.f32.mrf.mxu0  ;;  %v660_v55 = vpop.f32.mrf.mxu1 }
 0x316   :  { %v703_v46 = vadd.f32 %v640_v2, %v619_v4  ;;  %v704_v6 = vadd.f32 %v660_v55, %v620_v3 }
 0x318   :  { %v707_v17 = vmul.f32 0.5, %v703_v46  ;;  %v711_v10 = vmul.f32 0.5, %v704_v6 }
 0x31a   :  { %1247 = vtanh.f32 %v707_v17 }
 0x31b   :  { %1249 = vtanh.f32 %v711_v10 }
 0x31c   :  { %v680_v16 = vpop.f32.mrf.mxu2  ;;  %v700_v22 = vpop.f32.mrf.mxu3 }
 0x31d   :  { %v705_v18 = vadd.f32 %v680_v16, %v621_v26  ;;  %v706_v21 = vadd.f32 %v700_v22, %v622_v28 }
 0x31f   :  { %1251 = vtanh.f32 %v705_v18  ;;  %v716_v20 = vmul.f32 0.5, %v706_v21 }
 0x320   :  { %v1248_v2 = vpop.eup %1247 }
 0x321   :  { %v1250_v55 = vpop.eup %1249  ;;  %v709_v3 = vmul.f32 0.5, %v1248_v2  ;;  %1253 = vtanh.f32 %v716_v20 }
 0x322   :  { %v713_v4 = vmul.f32 0.5, %v1250_v55 }
 0x323   :  { %v710_v19 = vadd.f32 0.5, %v709_v3 }
 0x324   :  { %v714_v46 = vadd.f32 0.5, %v713_v4 }
 0x325   :  { %v1252_v6 = vpop.eup %1251 }
 0x326   :  { %v720_v10 = vmul.f32 %v714_v46, %v2159_v62  ;;  %v721_v17 = vmul.f32 %v1252_v6, %v710_v19  ;;  %v2619_v62 = vld [vmem:[#allocation20_spill] sm:$0xff] }
 0x327   :  { %v1254_v5 = vpop.eup %1253 }
 0x328   :  { %v2266_v24 = vadd.f32 %v721_v17, %v720_v10  ;;  %v718_v26 = vmul.f32 0.5, %v1254_v5 }
 0x32a   :  { %1255 = vtanh.f32 %v2266_v24  ;;  %v719_v16 = vadd.f32 0.5, %v718_v26 }
 0x330   :  { %v1256_v18 = vpop.eup %1255 }
 0x331   :  { %v724_v28 = vmul.f32 %v1256_v18, %v719_v16 }
 0x333   :  { %758 = vmatmul.f32.vlgmr.msrb.gmra.mxu0 %v724_v28  ;;  %778 = vmatmul.f32.vlgmr.msrb.gmra.mxu1 %v724_v28  ;;  %v1102_v23 = vmul.f32 %v1822_v61, %v724_v28  ;;  %v2618_v61 = vld [vmem:[#allocation19_spill] sm:$0xff] }
 0x334   :  { %798 = vmatmul.f32.vlgmr.msrb.gmra.mxu2 %v724_v28  ;;  %818 = vmatmul.f32.vlgmr.msrb.gmra.mxu3 %v724_v28 }
 0x335   :  { %1114 = vadd.xlane.f32.xlu1 %v1102_v23  ;;  %980 = vmatpush.msrb.mxu0 %v1988_v7  ;;  %v2620_v7 = vld [vmem:[#allocation21_spill] sm:$0xff] }
 0x336   :  { %1000 = vmatpush.msrb.mxu1 %v1991_v49  ;;  %1020 = vmatpush.msrb.mxu2 %v1994_v8  ;;  %v2621_v49 = vld [vmem:[#allocation22_spill] sm:$0xff]  ;;  %v2622_v8 = vld [vmem:[#allocation23_spill] sm:$0xff] }
 0x337   :  { %1040 = vmatpush.msrb.mxu3 %v1997_v9  ;;  %981 = vmatpush.msrb.mxu0 %v2000_v25  ;;  %v2623_v9 = vld [vmem:[#allocation24_spill] sm:$0xff]  ;;  %v2624_v25 = vld [vmem:[#allocation25_spill] sm:$0xff] }
 0x338   :  { %1001 = vmatpush.msrb.mxu1 %v2003_v27  ;;  %1021 = vmatpush.msrb.mxu2 %v2006_v29  ;;  %v2625_v27 = vld [vmem:[#allocation26_spill] sm:$0xff]  ;;  %v2626_v29 = vld [vmem:[#allocation27_spill] sm:$0xff] }
 0x339   :  { %1041 = vmatpush.msrb.mxu3 %v2009_v30  ;;  %982 = vmatpush.msrb.mxu0 %v2012_v32  ;;  %v2627_v30 = vld [vmem:[#allocation28_spill] sm:$0xff]  ;;  %v2628_v32 = vld [vmem:[#allocation29_spill] sm:$0xff] }
 0x33a   :  { %1002 = vmatpush.msrb.mxu1 %v2015_v33  ;;  %1022 = vmatpush.msrb.mxu2 %v2018_v34  ;;  %v2629_v33 = vld [vmem:[#allocation30_spill] sm:$0xff]  ;;  %v2630_v34 = vld [vmem:[#allocation31_spill] sm:$0xff] }
 0x33b   :  { %1042 = vmatpush.msrb.mxu3 %v2021_v35  ;;  %983 = vmatpush.msrb.mxu0 %v2024_v36  ;;  %v2631_v35 = vld [vmem:[#allocation32_spill] sm:$0xff]  ;;  %v2632_v36 = vld [vmem:[#allocation33_spill] sm:$0xff] }
 0x33c   :  { %1003 = vmatpush.msrb.mxu1 %v2027_v38  ;;  %1023 = vmatpush.msrb.mxu2 %v2030_v40  ;;  %v2633_v38 = vld [vmem:[#allocation34_spill] sm:$0xff]  ;;  %v2634_v40 = vld [vmem:[#allocation39_spill] sm:$0xff] }
 0x33d   :  { %1043 = vmatpush.msrb.mxu3 %v2033_v41  ;;  %984 = vmatpush.msrb.mxu0 %v2036_v42  ;;  %v2635_v41 = vld [vmem:[#allocation40_spill] sm:$0xff] }
 0x33e   :  { %1004 = vmatpush.msrb.mxu1 %v2039_v63  ;;  %1024 = vmatpush.msrb.mxu2 %v2042_v51  ;;  %v2636_v42 = vld [vmem:[#allocation12_spill] sm:$0xff]  ;;  %v2637_v63 = vld [vmem:[#allocation13_spill] sm:$0xff]  ;;  %v2638_v51 = vld [vmem:[#allocation14_spill] sm:$0xff] }
 0x33f   :  { %1044 = vmatpush.msrb.mxu3 %v2045_v50  ;;  %985 = vmatpush.msrb.mxu0 %v2048_v56  ;;  %v2639_v50 = vld [vmem:[#allocation15_spill] sm:$0xff]  ;;  %v2640_v56 = vld [vmem:[#allocation16_spill] sm:$0xff] }
 0x340   :  { %1005 = vmatpush.msrb.mxu1 %v2051_v60  ;;  %1025 = vmatpush.msrb.mxu2 %v2054_v45  ;;  %v2641_v60 = vld [vmem:[#allocation17_spill] sm:$0xff]  ;;  %v732_v45 = vpop.permute.xlu2 %731 }
 0x341   :  { %1045 = vmatpush.msrb.mxu3 %v2057_v59  ;;  %986 = vmatpush.msrb.mxu0 %v2060_v52  ;;  %v2642_v59 = vld [vmem:[#allocation35_spill] sm:$0xff] }
 0x342   :  { %1006 = vmatpush.msrb.mxu1 %v2063_v53  ;;  %1026 = vmatpush.msrb.mxu2 %v2066_v1  ;;  %v734_v52 = vmul.f32 %v732_v45, %v2642_v59  ;;  %v2643_v53 = vld [vmem:[#allocation36_spill] sm:$0xff] }
 0x343   :  { %1046 = vmatpush.msrb.mxu3 %v2069_v43  ;;  %987 = vmatpush.msrb.mxu0 %v2072_v47  ;;  %v735_v1 = vmul.f32 %v732_v45, %v2643_v53  ;;  %v2644_v43 = vld [vmem:[#allocation37_spill] sm:$0xff] }
 0x344   :  { %1007 = vmatpush.msrb.mxu1 %v2075_v0  ;;  %1027 = vmatpush.msrb.mxu2 %v2078_v44  ;;  %v738_v47 = vadd.f32 %v734_v52, %v2644_v43  ;;  %v2645_v0 = vld [vmem:[#allocation38_spill] sm:$0xff] }
 0x345   :  { %1047 = vmatpush.msrb.mxu3 %v2081_v57  ;;  %988 = vmatpush.msrb.mxu0 %v2084_v58  ;;  %v739_v44 = vadd.f32 %v735_v1, %v2645_v0 }
 0x346   :  { %1008 = vmatpush.msrb.mxu1 %v2589_v31  ;;  %1028 = vmatpush.msrb.mxu2 %v2590_v54 }
 0x347   :  { %1048 = vmatpush.msrb.mxu3 %v2591_v11  ;;  %989 = vmatpush.msrb.mxu0 %v2592_v12  ;;  %v736_v11 = vmul.f32 %v732_v45, %v2570_v37  ;;  %v737_v12 = vmul.f32 %v732_v45, %v2571_v39 }
 0x348   :  { %1009 = vmatpush.msrb.mxu1 %v2593_v13  ;;  %1029 = vmatpush.msrb.mxu2 %v2594_v14 }
 0x349   :  { %1049 = vmatpush.msrb.mxu3 %v2595_v15  ;;  %990 = vmatpush.msrb.mxu0 %v2618_v61  ;;  %v2646_v15 = vld [vmem:[#allocation41_spill] sm:$0xff]  ;;  %v741_v22 = vadd.f32 %v737_v12, %v1812_v48 }
 0x34a   :  { %1010 = vmatpush.msrb.mxu1 %v2619_v62  ;;  %1030 = vmatpush.msrb.mxu2 %v2620_v7  ;;  %v740_v20 = vadd.f32 %v736_v11, %v2646_v15 }
 0x34b   :  { %1050 = vmatpush.msrb.mxu3 %v2621_v49  ;;  %991 = vmatpush.msrb.mxu0 %v2622_v8  ;;  %v2346_v8 = vld [vmem:[%s2374_s4] ss:$0 sm:$0xff]  ;;  %s1409_s4 = smov [#allocation9]  }
 0x34c   :  { %1011 = vmatpush.msrb.mxu1 %v2623_v9  ;;  %1031 = vmatpush.msrb.mxu2 %v2624_v25  ;;  %s1177_s25 = sshll.u32 %s1409_s4, 4  ;;  %s1178_s25 = int_to_ptr.vmem [resolvable:$true] %s1177_s25 }
 0x34d   :  { %1051 = vmatpush.msrb.mxu3 %v2625_v27  ;;  %992 = vmatpush.msrb.mxu0 %v2626_v29 }
 0x34e   :  { %1012 = vmatpush.msrb.mxu1 %v2627_v30  ;;  %1032 = vmatpush.msrb.mxu2 %v2628_v32 }
 0x34f   :  { %1052 = vmatpush.msrb.mxu3 %v2629_v33  ;;  %993 = vmatpush.msrb.mxu0 %v2630_v34 }
 0x350   :  { %1013 = vmatpush.msrb.mxu1 %v2631_v35  ;;  %1033 = vmatpush.msrb.mxu2 %v2632_v36 }
 0x351   :  { %1053 = vmatpush.msrb.mxu3 %v2633_v38  ;;  %994 = vmatpush.msrb.mxu0 %v2634_v40 }
 0x352   :  { %1014 = vmatpush.msrb.mxu1 %v2635_v41  ;;  %1034 = vmatpush.msrb.mxu2 %v2636_v42 }
 0x353   :  { %1054 = vmatpush.msrb.mxu3 %v2637_v63  ;;  %995 = vmatpush.msrb.mxu0 %v2638_v51 }
 0x354   :  { %1015 = vmatpush.msrb.mxu1 %v2639_v50  ;;  %1035 = vmatpush.msrb.mxu2 %v2640_v56 }
 0x355   :  { %1055 = vmatpush.msrb.mxu3 %v2641_v60 }
 0x3b0   :  { %v759_v57 = vpop.f32.mrf.mxu0  ;;  %v779_v58 = vpop.f32.mrf.mxu1 }
 0x3b1   :  { %v822_v31 = vadd.f32 %v759_v57, %v738_v47  ;;  %v823_v54 = vadd.f32 %v779_v58, %v739_v44 }
 0x3b3   :  { %v826_v13 = vmul.f32 0.5, %v822_v31  ;;  %v830_v14 = vmul.f32 0.5, %v823_v54 }
 0x3b5   :  { %1257 = vtanh.f32 %v826_v13 }
 0x3b6   :  { %1259 = vtanh.f32 %v830_v14 }
 0x3b7   :  { %v799_v21 = vpop.f32.mrf.mxu2  ;;  %v819_v2 = vpop.f32.mrf.mxu3 }
 0x3b8   :  { %v824_v55 = vadd.f32 %v799_v21, %v740_v20  ;;  %v825_v3 = vadd.f32 %v819_v2, %v741_v22 }
 0x3ba   :  { %1261 = vtanh.f32 %v824_v55  ;;  %v835_v4 = vmul.f32 0.5, %v825_v3  ;;  %v970_v55 = vpop.permute.xlu1 %969 }
 0x3bb   :  { %v1258_v19 = vpop.eup %1257  ;;  %v972_v3 = vmul.f32 %v970_v55, %v2642_v59 }
 0x3bc   :  { %v1260_v46 = vpop.eup %1259  ;;  %v828_v6 = vmul.f32 0.5, %v1258_v19  ;;  %1263 = vtanh.f32 %v835_v4  ;;  %v973_v4 = vmul.f32 %v970_v55, %v2643_v53 }
 0x3bd   :  { %v832_v10 = vmul.f32 0.5, %v1260_v46  ;;  %v976_v19 = vadd.f32 %v972_v3, %v2644_v43 }
 0x3be   :  { %v829_v17 = vadd.f32 0.5, %v828_v6  ;;  %v977_v46 = vadd.f32 %v973_v4, %v2645_v0 }
 0x3bf   :  { %v833_v5 = vadd.f32 0.5, %v832_v10 }
 0x3c0   :  { %v1262_v26 = vpop.eup %1261 }
 0x3c1   :  { %v839_v16 = vmul.f32 %v833_v5, %v2266_v24  ;;  %v840_v18 = vmul.f32 %v1262_v26, %v829_v17  ;;  %v851_v24 = vpop.permute.xlu0 %850  ;;  %v974_v26 = vmul.f32 %v970_v55, %v2570_v37 }
 0x3c2   :  { %v1264_v28 = vpop.eup %1263  ;;  %v853_v25 = vmul.f32 %v851_v24, %v2642_v59  ;;  %v854_v27 = vmul.f32 %v851_v24, %v2643_v53  ;;  %v855_v36 = vmul.f32 %v851_v24, %v2570_v37  ;;  %v856_v38 = vmul.f32 %v851_v24, %v2571_v39 }
 0x3c3   :  { %v841_v23 = vadd.f32 %v840_v18, %v839_v16  ;;  %v837_v61 = vmul.f32 0.5, %v1264_v28  ;;  %v975_v16 = vmul.f32 %v970_v55, %v2571_v39  ;;  %v978_v59 = vadd.f32 %v974_v26, %v2646_v15 }
 0x3c4   :  { %v857_v29 = vadd.f32 %v853_v25, %v2644_v43  ;;  %v858_v30 = vadd.f32 %v854_v27, %v2645_v0  ;;  %v859_v42 = vadd.f32 %v855_v36, %v2646_v15  ;;  %v860_v63 = vadd.f32 %v856_v38, %v1812_v48  ;;  %v1111_v38 = vpop.xlane.xlu1 %1110 }
 0x3c5   :  { %1265 = vtanh.f32 %v841_v23  ;;  %v838_v62 = vadd.f32 0.5, %v837_v61  ;;  %v979_v53 = vadd.f32 %v975_v16, %v1812_v48 }
 0x3c9   :  { %v1109_v36 = vpop.xlane.xlu0 %1108 }
 0x3cb   :  { %v1266_v7 = vpop.eup %1265 }
 0x3cc   :  { %v843_v49 = vmul.f32 %v1266_v7, %v838_v62 }
 0x3ce   :  { %877 = vmatmul.f32.vlgmr.msra.gmra.mxu0 %v843_v49  ;;  %897 = vmatmul.f32.vlgmr.msra.gmra.mxu1 %v843_v49  ;;  %v1103_v9 = vmul.f32 %v2346_v8, %v843_v49 }
 0x3cf   :  { %917 = vmatmul.f32.vlgmr.msra.gmra.mxu2 %v843_v49  ;;  %937 = vmatmul.f32.vlgmr.msra.gmra.mxu3 %v843_v49 }
 0x3d0   :  { %1116 = vadd.xlane.f32.xlu0 %v1103_v9 }
 0x44b   :  { %v878_v32 = vpop.f32.mrf.mxu0  ;;  %v898_v33 = vpop.f32.mrf.mxu1 }
 0x44c   :  { %v941_v34 = vadd.f32 %v878_v32, %v857_v29  ;;  %v942_v35 = vadd.f32 %v898_v33, %v858_v30 }
 0x44e   :  { %v945_v40 = vmul.f32 0.5, %v941_v34  ;;  %v949_v41 = vmul.f32 0.5, %v942_v35 }
 0x450   :  { %1267 = vtanh.f32 %v945_v40  ;;  %v1127_v40 = vpop.permute.xlu2 %1126 }
 0x451   :  { %1269 = vtanh.f32 %v949_v41  ;;  %v1113_v41 = vpop.xlane.xlu0 %1112 }
 0x452   :  { %v918_v51 = vpop.f32.mrf.mxu2  ;;  %v938_v50 = vpop.f32.mrf.mxu3 }
 0x453   :  { %v943_v56 = vadd.f32 %v918_v51, %v859_v42  ;;  %v944_v60 = vadd.f32 %v938_v50, %v860_v63  ;;  %v1115_v42 = vpop.xlane.xlu1 %1114  ;;  %v1145_v63 = vlaneseq  ;;  %v1130_v50 = vadd.f32 %v1127_v40, %v1109_v36 }
 0x455   :  { %1271 = vtanh.f32 %v943_v56  ;;  %v954_v45 = vmul.f32 0.5, %v944_v60  ;;  %v1131_v56 = vadd.f32 %v1127_v40, %v1111_v38 }
 0x456   :  { %v1268_v52 = vpop.eup %1267 }
 0x457   :  { %v1270_v1 = vpop.eup %1269  ;;  %v947_v47 = vmul.f32 0.5, %v1268_v52  ;;  %1273 = vtanh.f32 %v954_v45  ;;  %v1146_v45 = vand.u32 127, %v1145_v63 }
 0x458   :  { %v951_v44 = vmul.f32 0.5, %v1270_v1  ;;  %v1107_v51 = vpop.xlane.xlu2 %1106  ;;  %v1132_v1 = vadd.f32 %v1127_v40, %v1113_v41 }
 0x459   :  { %v948_v57 = vadd.f32 0.5, %v947_v47  ;;  %v1117_v60 = vpop.xlane.xlu0 %1116  ;;  %v1129_v52 = vadd.f32 %v1127_v40, %v1107_v51 }
 0x45a   :  { %v952_v58 = vadd.f32 0.5, %v951_v44  ;;  %v1133_v44 = vadd.f32 %v1127_v40, %v1115_v42 }
 0x45b   :  { %v1272_v31 = vpop.eup %1271 }
 0x45c   :  { %v958_v54 = vmul.f32 %v952_v58, %v841_v23  ;;  %v959_v11 = vmul.f32 %v1272_v31, %v948_v57  ;;  %v1148_v57 = vperm.slane %v1130_v50, %v1146_v45  ;;  %v1134_v58 = vadd.f32 %v1127_v40, %v1117_v60 }
 0x45d   :  { %v1274_v12 = vpop.eup %1273 }
 0x45e   :  { %v960_v13 = vadd.f32 %v959_v11, %v958_v54  ;;  %v956_v14 = vmul.f32 0.5, %v1274_v12  ;;  %v1147_v54 = vperm.slane %v1129_v52, %v1146_v45  ;;  %v1150_v11 = vperm.slane %v1132_v1, %v1146_v45 }
 0x45f   :  { %v1151_v12 = vperm.slane %v1133_v44, %v1146_v45 }
 0x460   :  { %1275 = vtanh.f32 %v960_v13  ;;  %v957_v20 = vadd.f32 0.5, %v956_v14  ;;  %v1152_v14 = vperm.slane %v1134_v58, %v1146_v45 }
 0x466   :  { %v1276_v22 = vpop.eup %1275 }
 0x467   :  { %v962_v21 = vmul.f32 %v1276_v22, %v957_v20 }
 0x469   :  { %996 = vmatmul.f32.vlgmr.msrb.gmra.mxu0 %v962_v21  ;;  %1016 = vmatmul.f32.vlgmr.msrb.gmra.mxu1 %v962_v21  ;;  %v1104_v2 = vmul.f32 %v2346_v8, %v962_v21 }
 0x46a   :  { %1036 = vmatmul.f32.vlgmr.msrb.gmra.mxu2 %v962_v21  ;;  %1056 = vmatmul.f32.vlgmr.msrb.gmra.mxu3 %v962_v21 }
 0x46b   :  { %1118 = vadd.xlane.f32.xlu1 %v1104_v2 }
 0x4de   :  { %v1119_v47 = vpop.xlane.xlu1 %1118 }
 0x4df   :  { %v1135_v31 = vadd.f32 %v1127_v40, %v1119_v47 }
 0x4e1   :  { %v1153_v22 = vperm.slane %v1135_v31, %v1146_v45 }
 0x4e6   :  { %v997_v6 = vpop.f32.mrf.mxu0  ;;  %v1017_v10 = vpop.f32.mrf.mxu1 }
 0x4e7   :  { %v1060_v17 = vadd.f32 %v997_v6, %v976_v19  ;;  %v1061_v5 = vadd.f32 %v1017_v10, %v977_v46 }
 0x4e9   :  { %v1064_v18 = vmul.f32 0.5, %v1060_v17  ;;  %v1068_v28 = vmul.f32 0.5, %v1061_v5 }
 0x4eb   :  { %1277 = vtanh.f32 %v1064_v18 }
 0x4ec   :  { %1279 = vtanh.f32 %v1068_v28 }
 0x4ed   :  { %v1037_v23 = vpop.f32.mrf.mxu2  ;;  %v1057_v43 = vpop.f32.mrf.mxu3 }
 0x4ee   :  { %v1062_v61 = vadd.f32 %v1037_v23, %v978_v59  ;;  %v1063_v0 = vadd.f32 %v1057_v43, %v979_v53 }
 0x4f0   :  { %1281 = vtanh.f32 %v1062_v61  ;;  %v1073_v62 = vmul.f32 0.5, %v1063_v0 }
 0x4f1   :  { %v1278_v7 = vpop.eup %1277 }
 0x4f2   :  { %v1280_v49 = vpop.eup %1279  ;;  %v1066_v9 = vmul.f32 0.5, %v1278_v7  ;;  %1283 = vtanh.f32 %v1073_v62 }
 0x4f3   :  { %v1070_v37 = vmul.f32 0.5, %v1280_v49 }
 0x4f4   :  { %v1067_v39 = vadd.f32 0.5, %v1066_v9 }
 0x4f5   :  { %v1071_v24 = vadd.f32 0.5, %v1070_v37 }
 0x4f6   :  { %v1282_v25 = vpop.eup %1281 }
 0x4f7   :  { %v1077_v27 = vmul.f32 %v1071_v24, %v960_v13  ;;  %v1078_v29 = vmul.f32 %v1282_v25, %v1067_v39  ;;  %v1156_v13 = vsel %vm1155_vm0, %v1148_v57, %v1147_v54 }
 0x4f8   :  { %v1284_v30 = vpop.eup %1283 }
 0x4f9   :  { %v1079_v15 = vadd.f32 %v1078_v29, %v1077_v27  ;;  %v1075_v48 = vmul.f32 0.5, %v1284_v30 }
 0x4fb   :  { %1285 = vtanh.f32 %v1079_v15  ;;  %v1076_v32 = vadd.f32 0.5, %v1075_v48 }
 0x501   :  { %v1286_v33 = vpop.eup %1285 }
 0x502   :  { %v1081_v34 = vmul.f32 %v1286_v33, %v1076_v32 }
 0x504   :  { %v1105_v35 = vmul.f32 %v2346_v8, %v1081_v34  ;;  %v1149_v8 = vperm.slane %v1131_v56, %v1146_v45 }
 0x506   :  { %1120 = vadd.xlane.f32.xlu2 %v1105_v35  ;;  %v1158_v20 = vsel %vm1157_vm1, %v1149_v8, %v1156_v13 }
 0x507   :  { %v1160_v2 = vsel %vm1159_vm2, %v1150_v11, %v1158_v20 }
 0x508   :  { %v1162_v3 = vsel %vm1161_vm3, %v1151_v12, %v1160_v2 }
 0x509   :  { %v1164_v4 = vsel %vm1163_vm4, %v1152_v14, %v1162_v3 }
 0x50a   :  { %v1166_v46 = vsel %vm1165_vm5, %v1153_v22, %v1164_v4 }
 0x579   :  { %v1121_v21 = vpop.xlane.xlu2 %1120 }
 0x57a   :  { %v1136_v55 = vadd.f32 %v1127_v40, %v1121_v21 }
 0x57c   :  { %v1154_v19 = vperm.slane %v1136_v55, %v1146_v45 }
 0x57e   :  { %v1168_v6 = vsel %vm1167_vm6, %v1154_v19, %v1166_v46 }
 0x57f   :  { %1171 = vst.msk [vmem:[#allocation9] sm:$0xff] %vm1170_vm7, %v1168_v6 }
 0x580   :  { %1182 = dma.vmem_to_hbm [thread:$0]  %s1178_s25, 128, %s1180_s28, [#allocation8]  }
 0x581   :  { %1402 = dma.done.wait [#allocation8], 128  }
 0x582   :  { %1403 = vsyncadd [#allocation8], 4294967168 }
 0x583   :  { %1187 = vsyncpa [#allocation7], 1 }
 0x584   :  { %1188 = vsyncpa [#allocation8], 1 }

</bundles_post_ra>
